<compile_context>
chip_gen: v7x
topology: tpu7x:2x2x1
jax: 0.10.0
libtpu: 0.0.40
codegen_flags: <defaults>
</compile_context>

<pallas_src>
import functools
import math

import jax
import jax.numpy as jnp
from jax import lax
from jax.experimental import pallas as pl
from jax.experimental.pallas import tpu as pltpu


def _embedding_gather_kernel(ids_ref, table_hbm, out_ref, row_buf, sem, *,
                             scale, token_tile, d, d_pad, unroll):
    # ids_ref:   (n_pad,)                 int32, SMEM (scalar prefetch)
    # table_hbm: (V, d)                   table.dtype, HBM (no auto-DMA)
    # out_ref:   (token_tile, d_pad)      table.dtype, VMEM output block
    # row_buf:   (2, token_tile, d_pad)   table.dtype, 2-slot gather buffers
    # sem:       (2,) DMA semaphores, one per slot.  Per-slot semaphores are
    #            required: a shared one would let the drain of slot i consume
    #            completion signals from the slot i+1 prefetch (race/hang).
    o = pl.program_id(0)           # "parallel" super-tile axis (megacore)
    ti = pl.program_id(1)          # "arbitrary" tile axis (carries prefetch state)
    nt_inner = pl.num_programs(1)
    g = o * nt_inner + ti          # global token-tile index
    slot = ti & 1

    def row_copy(tok, dst_slot, r):
        # Copy exactly d elements of the (unpadded) table row into the first
        # d lanes of the d_pad-wide landing row.
        if d == d_pad:
            dst = row_buf.at[dst_slot, r]
        else:
            dst = row_buf.at[dst_slot, r, pl.ds(0, d)]
        return pltpu.make_async_copy(table_hbm.at[tok], dst, sem.at[dst_slot])

    def issue_tile(tile_idx, dst_slot):
        base = tile_idx * token_tile

        def body(r, carry):
            row_copy(ids_ref[base + r], dst_slot, r).start()
            return carry

        lax.fori_loop(0, token_tile, body, 0, unroll=unroll)

    def drain_tile(dst_slot):
        def body(r, carry):
            # Dummy source row 0 only supplies the byte count; it MUST stay
            # the same shape/dtype as the issue copies above (d elements of
            # table.dtype) or the waits will mismatch and hang.
            row_copy(0, dst_slot, r).wait()
            return carry

        lax.fori_loop(0, token_tile, body, 0, unroll=unroll)

    # Prime the pipeline: first tile of this super-step.  Runs once per
    # core-local chunk, so the pattern stays correct when the outer axis is
    # sharded across TensorCores (v7x megacore).
    @pl.when(ti == 0)
    def _():
        issue_tile(g, 0)

    # Cross-step prefetch: start gathering the NEXT tile's rows into the
    # other slot BEFORE draining this one, so descriptor issue + HBM latency
    # overlap this tile's wait + scale + store.
    @pl.when(ti + 1 < nt_inner)
    def _():
        issue_tile(g + 1, (ti + 1) & 1)

    drain_tile(slot)

    vals = row_buf[slot].astype(jnp.float32) * scale
    if d != d_pad:
        # Pad lanes are never DMA'd; zero them so the (sliced-off) padded
        # output region is deterministic.  Free VPU filler under the DMA
        # bottleneck.
        lane = lax.broadcasted_iota(jnp.int32, (token_tile, d_pad), 1)
        vals = jnp.where(lane < d, vals, 0.0)
    out_ref[...] = vals.astype(out_ref.dtype)


def embeddings_forward(x_ids, table, *, token_tile=None):
    """table[x_ids] * sqrt(d_model) as a Pallas TPU kernel.

    x_ids: integer token ids of any shape; table: (V, D) embedding weight
    (float32 or bfloat16).  Returns x_ids.shape + (D,) in table.dtype.
    """
    v, d = table.shape
    assert table.dtype in (jnp.float32, jnp.bfloat16), table.dtype
    orig_shape = tuple(int(s) for s in x_ids.shape)
    n = 1
    for s in orig_shape:
        n *= s
    scale = math.sqrt(d)

    itemsize = jnp.dtype(table.dtype).itemsize
    d_pad = pl.cdiv(d, 128) * 128          # lane-dense output stores

    if token_tile is None:
        # ~4 live (token_tile, d_pad) buffers (2 gather slots + pipelined
        # output); keep them <= ~8 MiB so the kernel fits v5e's 16 MiB
        # default scoped VMEM and v7x's 64 MiB physical VMEM (2 cores).
        budget = 8 * 1024 * 1024
        token_tile = budget // (4 * d_pad * itemsize)
        token_tile = max(8, min(512, (token_tile // 8) * 8))
        token_tile = min(token_tile, max(8, ((n + 7) // 8) * 8))  # tiny inputs
    assert token_tile % 8 == 0, "token_tile must be a multiple of 8 (sublanes)"

    # nn.Embedding raises on out-of-range ids; we clamp instead (intentional
    # semantic difference — avoids device-side faults).
    ids_flat = jnp.clip(x_ids.reshape(n).astype(jnp.int32), 0, v - 1)

    num_tiles = pl.cdiv(n, token_tile)
    num_super = 2 if num_tiles >= 2 else 1      # >= 2 so both v7x cores get work
    tiles_per_super = pl.cdiv(num_tiles, num_super)
    n_pad = num_super * tiles_per_super * token_tile
    if n_pad != n:
        ids_flat = jnp.pad(ids_flat, (0, n_pad - n))   # pad tokens gather row 0

    buf_bytes = token_tile * d_pad * itemsize
    vmem_limit = int(min(48 * 1024 * 1024, max(16 * 1024 * 1024, 6 * buf_bytes)))
    unroll = max(1, min(8, token_tile))

    out_flat = pl.pallas_call(
        functools.partial(_embedding_gather_kernel,
                          scale=scale, token_tile=token_tile,
                          d=d, d_pad=d_pad, unroll=unroll),
        out_shape=jax.ShapeDtypeStruct((n_pad, d_pad), table.dtype),
        grid_spec=pltpu.PrefetchScalarGridSpec(
            num_scalar_prefetch=1,                    # ids -> SMEM
            grid=(num_super, tiles_per_super),
            in_specs=[
                pl.BlockSpec(memory_space=pl.ANY),    # table stays in HBM
            ],
            out_specs=pl.BlockSpec(
                (token_tile, d_pad),
                lambda o, t, ids: (o * tiles_per_super + t, 0)),
            scratch_shapes=[
                pltpu.VMEM((2, token_tile, d_pad), table.dtype),  # 2-slot gather
                pltpu.SemaphoreType.DMA((2,)),                    # one sem / slot
            ],
        ),
        compiler_params=pltpu.CompilerParams(
            dimension_semantics=("parallel", "arbitrary"),
            vmem_limit_bytes=vmem_limit,
        ),
    )(ids_flat, table)

    return out_flat[:n, :d].reshape(*orig_shape, d)


if __name__ == "__main__":
    vocab_len = 64
    d_model = 128          # lane-aligned, typical transformer width
    batch, seq = 2, 16

    key = jax.random.PRNGKey(0)
    k_table, k_ids = jax.random.split(key)

    # nn.Embedding default init: weight ~ N(0, 1)
    emb_weight = jax.random.normal(k_table, (vocab_len, d_model), jnp.float32)
    x = jax.random.randint(k_ids, (batch, seq), 0, vocab_len, jnp.int32)

    # token_tile=8 keeps the grid at (2 super-tiles x 2 tiles) for these tiny
    # shapes so the cross-step prefetch path is actually exercised.
    out = embeddings_forward(x, emb_weight, token_tile=8)
    out = jax.block_until_ready(out)

    # Reference check against plain-JAX embedding lookup.
    ref = emb_weight[x] * math.sqrt(d_model)
    assert out.shape == (batch, seq, d_model)
    assert out.dtype == emb_weight.dtype
    assert jnp.allclose(out, ref, atol=1e-5, rtol=1e-5)

    print("KERNEL_OK")
</pallas_src>

<mosaic_0001>
module attributes {stable_mosaic.version = 11 : i64} {
  func.func @_embedding_gather_kernel(%arg0: i32, %arg1: i32, %arg2: memref<32xi32, #tpu.memory_space<smem>>, %arg3: memref<64x128xf32, #tpu.memory_space<any>>, %arg4: memref<8x128xf32, #tpu.memory_space<vmem>>, %arg5: memref<2x8x128xf32, #tpu.memory_space<vmem>>, %arg6: memref<2x!tpu.dma_semaphore, #tpu.memory_space<semaphore_mem>>) attributes {dimension_semantics = [#tpu.dimension_semantics<parallel>, #tpu.dimension_semantics<arbitrary>], iteration_bounds = array<i64: 2, 2>, scalar_prefetch = 1 : i64, scratch_operands = 2 : i64, tpu.core_type = #tpu.core_type<tc>, window_params = [{}, {transform_indices = @transform_1, window_bounds = array<i64: 8, 128>}]} {
    %c2_i32 = arith.constant 2 : i32
    %0 = arith.muli %arg0, %c2_i32 : i32
    %1 = arith.addi %0, %arg1 : i32
    %c1_i32 = arith.constant 1 : i32
    %2 = arith.andi %arg1, %c1_i32 : i32
    %c0_i32 = arith.constant 0 : i32
    %3 = arith.cmpi eq, %arg1, %c0_i32 : i32
    %4 = arith.extui %3 : i1 to i32
    %c0_i32_0 = arith.constant 0 : i32
    %5 = arith.cmpi ne, %4, %c0_i32_0 : i32
    scf.if %5 {
      %c8_i32_34 = arith.constant 8 : i32
      %64 = arith.muli %1, %c8_i32_34 : i32
      %c0_i32_35 = arith.constant 0 : i32
      %65 = arith.addi %64, %c0_i32_35 : i32
      %66 = arith.index_cast %65 : i32 to index
      %67 = memref.load %arg2[%66] : memref<32xi32, #tpu.memory_space<smem>>
      %c0_i32_36 = arith.constant 0 : i32
      %c0_i32_37 = arith.constant 0 : i32
      %c0_i32_38 = arith.constant 0 : i32
      %68 = tpu.memref_slice %arg3[%67, %c0_i32_38] : memref<64x128xf32, #tpu.memory_space<any>> -> memref<1x128xf32, #tpu.memory_space<any>>
      %69 = tpu.memref_squeeze %68 : memref<1x128xf32, #tpu.memory_space<any>> -> memref<128xf32, #tpu.memory_space<any>>
      %c0_i32_39 = arith.constant 0 : i32
      %70 = tpu.memref_slice %arg5[%c0_i32_36, %c0_i32_35, %c0_i32_39] : memref<2x8x128xf32, #tpu.memory_space<vmem>> -> memref<1x1x128xf32, #tpu.memory_space<vmem>>
      %71 = tpu.memref_squeeze %70 : memref<1x1x128xf32, #tpu.memory_space<vmem>> -> memref<128xf32, #tpu.memory_space<vmem>>
      %72 = tpu.memref_slice %arg6[%c0_i32_37] : memref<2x!tpu.dma_semaphore, #tpu.memory_space<semaphore_mem>> -> memref<1x!tpu.dma_semaphore, #tpu.memory_space<semaphore_mem>>
      %73 = tpu.memref_squeeze %72 : memref<1x!tpu.dma_semaphore, #tpu.memory_space<semaphore_mem>> -> memref<!tpu.dma_semaphore, #tpu.memory_space<semaphore_mem>>
      tpu.enqueue_dma source(%69 : memref<128xf32, #tpu.memory_space<any>>) target(%71 : memref<128xf32, #tpu.memory_space<vmem>>) target_semaphore(%73 : memref<!tpu.dma_semaphore, #tpu.memory_space<semaphore_mem>>)
      %c1_i32_40 = arith.constant 1 : i32
      %74 = arith.addi %64, %c1_i32_40 : i32
      %75 = arith.index_cast %74 : i32 to index
      %76 = memref.load %arg2[%75] : memref<32xi32, #tpu.memory_space<smem>>
      %c0_i32_41 = arith.constant 0 : i32
      %c0_i32_42 = arith.constant 0 : i32
      %c0_i32_43 = arith.constant 0 : i32
      %77 = tpu.memref_slice %arg3[%76, %c0_i32_43] : memref<64x128xf32, #tpu.memory_space<any>> -> memref<1x128xf32, #tpu.memory_space<any>>
      %78 = tpu.memref_squeeze %77 : memref<1x128xf32, #tpu.memory_space<any>> -> memref<128xf32, #tpu.memory_space<any>>
      %c0_i32_44 = arith.constant 0 : i32
      %79 = tpu.memref_slice %arg5[%c0_i32_41, %c1_i32_40, %c0_i32_44] : memref<2x8x128xf32, #tpu.memory_space<vmem>> -> memref<1x1x128xf32, #tpu.memory_space<vmem>>
      %80 = tpu.memref_squeeze %79 : memref<1x1x128xf32, #tpu.memory_space<vmem>> -> memref<128xf32, #tpu.memory_space<vmem>>
      %81 = tpu.memref_slice %arg6[%c0_i32_42] : memref<2x!tpu.dma_semaphore, #tpu.memory_space<semaphore_mem>> -> memref<1x!tpu.dma_semaphore, #tpu.memory_space<semaphore_mem>>
      %82 = tpu.memref_squeeze %81 : memref<1x!tpu.dma_semaphore, #tpu.memory_space<semaphore_mem>> -> memref<!tpu.dma_semaphore, #tpu.memory_space<semaphore_mem>>
      tpu.enqueue_dma source(%78 : memref<128xf32, #tpu.memory_space<any>>) target(%80 : memref<128xf32, #tpu.memory_space<vmem>>) target_semaphore(%82 : memref<!tpu.dma_semaphore, #tpu.memory_space<semaphore_mem>>)
      %c2_i32_45 = arith.constant 2 : i32
      %83 = arith.addi %64, %c2_i32_45 : i32
      %84 = arith.index_cast %83 : i32 to index
      %85 = memref.load %arg2[%84] : memref<32xi32, #tpu.memory_space<smem>>
      %c0_i32_46 = arith.constant 0 : i32
      %c0_i32_47 = arith.constant 0 : i32
      %c0_i32_48 = arith.constant 0 : i32
      %86 = tpu.memref_slice %arg3[%85, %c0_i32_48] : memref<64x128xf32, #tpu.memory_space<any>> -> memref<1x128xf32, #tpu.memory_space<any>>
      %87 = tpu.memref_squeeze %86 : memref<1x128xf32, #tpu.memory_space<any>> -> memref<128xf32, #tpu.memory_space<any>>
      %c0_i32_49 = arith.constant 0 : i32
      %88 = tpu.memref_slice %arg5[%c0_i32_46, %c2_i32_45, %c0_i32_49] : memref<2x8x128xf32, #tpu.memory_space<vmem>> -> memref<1x1x128xf32, #tpu.memory_space<vmem>>
      %89 = tpu.memref_squeeze %88 : memref<1x1x128xf32, #tpu.memory_space<vmem>> -> memref<128xf32, #tpu.memory_space<vmem>>
      %90 = tpu.memref_slice %arg6[%c0_i32_47] : memref<2x!tpu.dma_semaphore, #tpu.memory_space<semaphore_mem>> -> memref<1x!tpu.dma_semaphore, #tpu.memory_space<semaphore_mem>>
      %91 = tpu.memref_squeeze %90 : memref<1x!tpu.dma_semaphore, #tpu.memory_space<semaphore_mem>> -> memref<!tpu.dma_semaphore, #tpu.memory_space<semaphore_mem>>
      tpu.enqueue_dma source(%87 : memref<128xf32, #tpu.memory_space<any>>) target(%89 : memref<128xf32, #tpu.memory_space<vmem>>) target_semaphore(%91 : memref<!tpu.dma_semaphore, #tpu.memory_space<semaphore_mem>>)
      %c3_i32_50 = arith.constant 3 : i32
      %92 = arith.addi %64, %c3_i32_50 : i32
      %93 = arith.index_cast %92 : i32 to index
      %94 = memref.load %arg2[%93] : memref<32xi32, #tpu.memory_space<smem>>
      %c0_i32_51 = arith.constant 0 : i32
      %c0_i32_52 = arith.constant 0 : i32
      %c0_i32_53 = arith.constant 0 : i32
      %95 = tpu.memref_slice %arg3[%94, %c0_i32_53] : memref<64x128xf32, #tpu.memory_space<any>> -> memref<1x128xf32, #tpu.memory_space<any>>
      %96 = tpu.memref_squeeze %95 : memref<1x128xf32, #tpu.memory_space<any>> -> memref<128xf32, #tpu.memory_space<any>>
      %c0_i32_54 = arith.constant 0 : i32
      %97 = tpu.memref_slice %arg5[%c0_i32_51, %c3_i32_50, %c0_i32_54] : memref<2x8x128xf32, #tpu.memory_space<vmem>> -> memref<1x1x128xf32, #tpu.memory_space<vmem>>
      %98 = tpu.memref_squeeze %97 : memref<1x1x128xf32, #tpu.memory_space<vmem>> -> memref<128xf32, #tpu.memory_space<vmem>>
      %99 = tpu.memref_slice %arg6[%c0_i32_52] : memref<2x!tpu.dma_semaphore, #tpu.memory_space<semaphore_mem>> -> memref<1x!tpu.dma_semaphore, #tpu.memory_space<semaphore_mem>>
      %100 = tpu.memref_squeeze %99 : memref<1x!tpu.dma_semaphore, #tpu.memory_space<semaphore_mem>> -> memref<!tpu.dma_semaphore, #tpu.memory_space<semaphore_mem>>
      tpu.enqueue_dma source(%96 : memref<128xf32, #tpu.memory_space<any>>) target(%98 : memref<128xf32, #tpu.memory_space<vmem>>) target_semaphore(%100 : memref<!tpu.dma_semaphore, #tpu.memory_space<semaphore_mem>>)
      %c4_i32_55 = arith.constant 4 : i32
      %101 = arith.addi %64, %c4_i32_55 : i32
      %102 = arith.index_cast %101 : i32 to index
      %103 = memref.load %arg2[%102] : memref<32xi32, #tpu.memory_space<smem>>
      %c0_i32_56 = arith.constant 0 : i32
      %c0_i32_57 = arith.constant 0 : i32
      %c0_i32_58 = arith.constant 0 : i32
      %104 = tpu.memref_slice %arg3[%103, %c0_i32_58] : memref<64x128xf32, #tpu.memory_space<any>> -> memref<1x128xf32, #tpu.memory_space<any>>
      %105 = tpu.memref_squeeze %104 : memref<1x128xf32, #tpu.memory_space<any>> -> memref<128xf32, #tpu.memory_space<any>>
      %c0_i32_59 = arith.constant 0 : i32
      %106 = tpu.memref_slice %arg5[%c0_i32_56, %c4_i32_55, %c0_i32_59] : memref<2x8x128xf32, #tpu.memory_space<vmem>> -> memref<1x1x128xf32, #tpu.memory_space<vmem>>
      %107 = tpu.memref_squeeze %106 : memref<1x1x128xf32, #tpu.memory_space<vmem>> -> memref<128xf32, #tpu.memory_space<vmem>>
      %108 = tpu.memref_slice %arg6[%c0_i32_57] : memref<2x!tpu.dma_semaphore, #tpu.memory_space<semaphore_mem>> -> memref<1x!tpu.dma_semaphore, #tpu.memory_space<semaphore_mem>>
      %109 = tpu.memref_squeeze %108 : memref<1x!tpu.dma_semaphore, #tpu.memory_space<semaphore_mem>> -> memref<!tpu.dma_semaphore, #tpu.memory_space<semaphore_mem>>
      tpu.enqueue_dma source(%105 : memref<128xf32, #tpu.memory_space<any>>) target(%107 : memref<128xf32, #tpu.memory_space<vmem>>) target_semaphore(%109 : memref<!tpu.dma_semaphore, #tpu.memory_space<semaphore_mem>>)
      %c5_i32_60 = arith.constant 5 : i32
      %110 = arith.addi %64, %c5_i32_60 : i32
      %111 = arith.index_cast %110 : i32 to index
      %112 = memref.load %arg2[%111] : memref<32xi32, #tpu.memory_space<smem>>
      %c0_i32_61 = arith.constant 0 : i32
      %c0_i32_62 = arith.constant 0 : i32
      %c0_i32_63 = arith.constant 0 : i32
      %113 = tpu.memref_slice %arg3[%112, %c0_i32_63] : memref<64x128xf32, #tpu.memory_space<any>> -> memref<1x128xf32, #tpu.memory_space<any>>
      %114 = tpu.memref_squeeze %113 : memref<1x128xf32, #tpu.memory_space<any>> -> memref<128xf32, #tpu.memory_space<any>>
      %c0_i32_64 = arith.constant 0 : i32
      %115 = tpu.memref_slice %arg5[%c0_i32_61, %c5_i32_60, %c0_i32_64] : memref<2x8x128xf32, #tpu.memory_space<vmem>> -> memref<1x1x128xf32, #tpu.memory_space<vmem>>
      %116 = tpu.memref_squeeze %115 : memref<1x1x128xf32, #tpu.memory_space<vmem>> -> memref<128xf32, #tpu.memory_space<vmem>>
      %117 = tpu.memref_slice %arg6[%c0_i32_62] : memref<2x!tpu.dma_semaphore, #tpu.memory_space<semaphore_mem>> -> memref<1x!tpu.dma_semaphore, #tpu.memory_space<semaphore_mem>>
      %118 = tpu.memref_squeeze %117 : memref<1x!tpu.dma_semaphore, #tpu.memory_space<semaphore_mem>> -> memref<!tpu.dma_semaphore, #tpu.memory_space<semaphore_mem>>
      tpu.enqueue_dma source(%114 : memref<128xf32, #tpu.memory_space<any>>) target(%116 : memref<128xf32, #tpu.memory_space<vmem>>) target_semaphore(%118 : memref<!tpu.dma_semaphore, #tpu.memory_space<semaphore_mem>>)
      %c6_i32_65 = arith.constant 6 : i32
      %119 = arith.addi %64, %c6_i32_65 : i32
      %120 = arith.index_cast %119 : i32 to index
      %121 = memref.load %arg2[%120] : memref<32xi32, #tpu.memory_space<smem>>
      %c0_i32_66 = arith.constant 0 : i32
      %c0_i32_67 = arith.constant 0 : i32
      %c0_i32_68 = arith.constant 0 : i32
      %122 = tpu.memref_slice %arg3[%121, %c0_i32_68] : memref<64x128xf32, #tpu.memory_space<any>> -> memref<1x128xf32, #tpu.memory_space<any>>
      %123 = tpu.memref_squeeze %122 : memref<1x128xf32, #tpu.memory_space<any>> -> memref<128xf32, #tpu.memory_space<any>>
      %c0_i32_69 = arith.constant 0 : i32
      %124 = tpu.memref_slice %arg5[%c0_i32_66, %c6_i32_65, %c0_i32_69] : memref<2x8x128xf32, #tpu.memory_space<vmem>> -> memref<1x1x128xf32, #tpu.memory_space<vmem>>
      %125 = tpu.memref_squeeze %124 : memref<1x1x128xf32, #tpu.memory_space<vmem>> -> memref<128xf32, #tpu.memory_space<vmem>>
      %126 = tpu.memref_slice %arg6[%c0_i32_67] : memref<2x!tpu.dma_semaphore, #tpu.memory_space<semaphore_mem>> -> memref<1x!tpu.dma_semaphore, #tpu.memory_space<semaphore_mem>>
      %127 = tpu.memref_squeeze %126 : memref<1x!tpu.dma_semaphore, #tpu.memory_space<semaphore_mem>> -> memref<!tpu.dma_semaphore, #tpu.memory_space<semaphore_mem>>
      tpu.enqueue_dma source(%123 : memref<128xf32, #tpu.memory_space<any>>) target(%125 : memref<128xf32, #tpu.memory_space<vmem>>) target_semaphore(%127 : memref<!tpu.dma_semaphore, #tpu.memory_space<semaphore_mem>>)
      %c7_i32_70 = arith.constant 7 : i32
      %128 = arith.addi %64, %c7_i32_70 : i32
      %129 = arith.index_cast %128 : i32 to index
      %130 = memref.load %arg2[%129] : memref<32xi32, #tpu.memory_space<smem>>
      %c0_i32_71 = arith.constant 0 : i32
      %c0_i32_72 = arith.constant 0 : i32
      %c0_i32_73 = arith.constant 0 : i32
      %131 = tpu.memref_slice %arg3[%130, %c0_i32_73] : memref<64x128xf32, #tpu.memory_space<any>> -> memref<1x128xf32, #tpu.memory_space<any>>
      %132 = tpu.memref_squeeze %131 : memref<1x128xf32, #tpu.memory_space<any>> -> memref<128xf32, #tpu.memory_space<any>>
      %c0_i32_74 = arith.constant 0 : i32
      %133 = tpu.memref_slice %arg5[%c0_i32_71, %c7_i32_70, %c0_i32_74] : memref<2x8x128xf32, #tpu.memory_space<vmem>> -> memref<1x1x128xf32, #tpu.memory_space<vmem>>
      %134 = tpu.memref_squeeze %133 : memref<1x1x128xf32, #tpu.memory_space<vmem>> -> memref<128xf32, #tpu.memory_space<vmem>>
      %135 = tpu.memref_slice %arg6[%c0_i32_72] : memref<2x!tpu.dma_semaphore, #tpu.memory_space<semaphore_mem>> -> memref<1x!tpu.dma_semaphore, #tpu.memory_space<semaphore_mem>>
      %136 = tpu.memref_squeeze %135 : memref<1x!tpu.dma_semaphore, #tpu.memory_space<semaphore_mem>> -> memref<!tpu.dma_semaphore, #tpu.memory_space<semaphore_mem>>
      tpu.enqueue_dma source(%132 : memref<128xf32, #tpu.memory_space<any>>) target(%134 : memref<128xf32, #tpu.memory_space<vmem>>) target_semaphore(%136 : memref<!tpu.dma_semaphore, #tpu.memory_space<semaphore_mem>>)
      %c8_i32_75 = arith.constant 8 : i32
    } else {
    }
    %c1_i32_1 = arith.constant 1 : i32
    %6 = arith.addi %arg1, %c1_i32_1 : i32
    %c2_i32_2 = arith.constant 2 : i32
    %7 = arith.cmpi slt, %6, %c2_i32_2 : i32
    %8 = arith.extui %7 : i1 to i32
    %c0_i32_3 = arith.constant 0 : i32
    %9 = arith.cmpi ne, %8, %c0_i32_3 : i32
    scf.if %9 {
      %c1_i32_34 = arith.constant 1 : i32
      %64 = arith.addi %1, %c1_i32_34 : i32
      %c1_i32_35 = arith.constant 1 : i32
      %65 = arith.addi %arg1, %c1_i32_35 : i32
      %c1_i32_36 = arith.constant 1 : i32
      %66 = arith.andi %65, %c1_i32_36 : i32
      %c8_i32_37 = arith.constant 8 : i32
      %67 = arith.muli %64, %c8_i32_37 : i32
      %c0_i32_38 = arith.constant 0 : i32
      %68 = arith.addi %67, %c0_i32_38 : i32
      %69 = arith.index_cast %68 : i32 to index
      %70 = memref.load %arg2[%69] : memref<32xi32, #tpu.memory_space<smem>>
      %c0_i32_39 = arith.constant 0 : i32
      %71 = tpu.memref_slice %arg3[%70, %c0_i32_39] : memref<64x128xf32, #tpu.memory_space<any>> -> memref<1x128xf32, #tpu.memory_space<any>>
      %72 = tpu.memref_squeeze %71 : memref<1x128xf32, #tpu.memory_space<any>> -> memref<128xf32, #tpu.memory_space<any>>
      %c0_i32_40 = arith.constant 0 : i32
      %73 = tpu.memref_slice %arg5[%66, %c0_i32_38, %c0_i32_40] : memref<2x8x128xf32, #tpu.memory_space<vmem>> -> memref<1x1x128xf32, #tpu.memory_space<vmem>>
      %74 = tpu.memref_squeeze %73 : memref<1x1x128xf32, #tpu.memory_space<vmem>> -> memref<128xf32, #tpu.memory_space<vmem>>
      %75 = tpu.memref_slice %arg6[%66] : memref<2x!tpu.dma_semaphore, #tpu.memory_space<semaphore_mem>> -> memref<1x!tpu.dma_semaphore, #tpu.memory_space<semaphore_mem>>
      %76 = tpu.memref_squeeze %75 : memref<1x!tpu.dma_semaphore, #tpu.memory_space<semaphore_mem>> -> memref<!tpu.dma_semaphore, #tpu.memory_space<semaphore_mem>>
      tpu.enqueue_dma source(%72 : memref<128xf32, #tpu.memory_space<any>>) target(%74 : memref<128xf32, #tpu.memory_space<vmem>>) target_semaphore(%76 : memref<!tpu.dma_semaphore, #tpu.memory_space<semaphore_mem>>)
      %c1_i32_41 = arith.constant 1 : i32
      %77 = arith.addi %67, %c1_i32_41 : i32
      %78 = arith.index_cast %77 : i32 to index
      %79 = memref.load %arg2[%78] : memref<32xi32, #tpu.memory_space<smem>>
      %c0_i32_42 = arith.constant 0 : i32
      %80 = tpu.memref_slice %arg3[%79, %c0_i32_42] : memref<64x128xf32, #tpu.memory_space<any>> -> memref<1x128xf32, #tpu.memory_space<any>>
      %81 = tpu.memref_squeeze %80 : memref<1x128xf32, #tpu.memory_space<any>> -> memref<128xf32, #tpu.memory_space<any>>
      %c0_i32_43 = arith.constant 0 : i32
      %82 = tpu.memref_slice %arg5[%66, %c1_i32_41, %c0_i32_43] : memref<2x8x128xf32, #tpu.memory_space<vmem>> -> memref<1x1x128xf32, #tpu.memory_space<vmem>>
      %83 = tpu.memref_squeeze %82 : memref<1x1x128xf32, #tpu.memory_space<vmem>> -> memref<128xf32, #tpu.memory_space<vmem>>
      %84 = tpu.memref_slice %arg6[%66] : memref<2x!tpu.dma_semaphore, #tpu.memory_space<semaphore_mem>> -> memref<1x!tpu.dma_semaphore, #tpu.memory_space<semaphore_mem>>
      %85 = tpu.memref_squeeze %84 : memref<1x!tpu.dma_semaphore, #tpu.memory_space<semaphore_mem>> -> memref<!tpu.dma_semaphore, #tpu.memory_space<semaphore_mem>>
      tpu.enqueue_dma source(%81 : memref<128xf32, #tpu.memory_space<any>>) target(%83 : memref<128xf32, #tpu.memory_space<vmem>>) target_semaphore(%85 : memref<!tpu.dma_semaphore, #tpu.memory_space<semaphore_mem>>)
      %c2_i32_44 = arith.constant 2 : i32
      %86 = arith.addi %67, %c2_i32_44 : i32
      %87 = arith.index_cast %86 : i32 to index
      %88 = memref.load %arg2[%87] : memref<32xi32, #tpu.memory_space<smem>>
      %c0_i32_45 = arith.constant 0 : i32
      %89 = tpu.memref_slice %arg3[%88, %c0_i32_45] : memref<64x128xf32, #tpu.memory_space<any>> -> memref<1x128xf32, #tpu.memory_space<any>>
      %90 = tpu.memref_squeeze %89 : memref<1x128xf32, #tpu.memory_space<any>> -> memref<128xf32, #tpu.memory_space<any>>
      %c0_i32_46 = arith.constant 0 : i32
      %91 = tpu.memref_slice %arg5[%66, %c2_i32_44, %c0_i32_46] : memref<2x8x128xf32, #tpu.memory_space<vmem>> -> memref<1x1x128xf32, #tpu.memory_space<vmem>>
      %92 = tpu.memref_squeeze %91 : memref<1x1x128xf32, #tpu.memory_space<vmem>> -> memref<128xf32, #tpu.memory_space<vmem>>
      %93 = tpu.memref_slice %arg6[%66] : memref<2x!tpu.dma_semaphore, #tpu.memory_space<semaphore_mem>> -> memref<1x!tpu.dma_semaphore, #tpu.memory_space<semaphore_mem>>
      %94 = tpu.memref_squeeze %93 : memref<1x!tpu.dma_semaphore, #tpu.memory_space<semaphore_mem>> -> memref<!tpu.dma_semaphore, #tpu.memory_space<semaphore_mem>>
      tpu.enqueue_dma source(%90 : memref<128xf32, #tpu.memory_space<any>>) target(%92 : memref<128xf32, #tpu.memory_space<vmem>>) target_semaphore(%94 : memref<!tpu.dma_semaphore, #tpu.memory_space<semaphore_mem>>)
      %c3_i32_47 = arith.constant 3 : i32
      %95 = arith.addi %67, %c3_i32_47 : i32
      %96 = arith.index_cast %95 : i32 to index
      %97 = memref.load %arg2[%96] : memref<32xi32, #tpu.memory_space<smem>>
      %c0_i32_48 = arith.constant 0 : i32
      %98 = tpu.memref_slice %arg3[%97, %c0_i32_48] : memref<64x128xf32, #tpu.memory_space<any>> -> memref<1x128xf32, #tpu.memory_space<any>>
      %99 = tpu.memref_squeeze %98 : memref<1x128xf32, #tpu.memory_space<any>> -> memref<128xf32, #tpu.memory_space<any>>
      %c0_i32_49 = arith.constant 0 : i32
      %100 = tpu.memref_slice %arg5[%66, %c3_i32_47, %c0_i32_49] : memref<2x8x128xf32, #tpu.memory_space<vmem>> -> memref<1x1x128xf32, #tpu.memory_space<vmem>>
      %101 = tpu.memref_squeeze %100 : memref<1x1x128xf32, #tpu.memory_space<vmem>> -> memref<128xf32, #tpu.memory_space<vmem>>
      %102 = tpu.memref_slice %arg6[%66] : memref<2x!tpu.dma_semaphore, #tpu.memory_space<semaphore_mem>> -> memref<1x!tpu.dma_semaphore, #tpu.memory_space<semaphore_mem>>
      %103 = tpu.memref_squeeze %102 : memref<1x!tpu.dma_semaphore, #tpu.memory_space<semaphore_mem>> -> memref<!tpu.dma_semaphore, #tpu.memory_space<semaphore_mem>>
      tpu.enqueue_dma source(%99 : memref<128xf32, #tpu.memory_space<any>>) target(%101 : memref<128xf32, #tpu.memory_space<vmem>>) target_semaphore(%103 : memref<!tpu.dma_semaphore, #tpu.memory_space<semaphore_mem>>)
      %c4_i32_50 = arith.constant 4 : i32
      %104 = arith.addi %67, %c4_i32_50 : i32
      %105 = arith.index_cast %104 : i32 to index
      %106 = memref.load %arg2[%105] : memref<32xi32, #tpu.memory_space<smem>>
      %c0_i32_51 = arith.constant 0 : i32
      %107 = tpu.memref_slice %arg3[%106, %c0_i32_51] : memref<64x128xf32, #tpu.memory_space<any>> -> memref<1x128xf32, #tpu.memory_space<any>>
      %108 = tpu.memref_squeeze %107 : memref<1x128xf32, #tpu.memory_space<any>> -> memref<128xf32, #tpu.memory_space<any>>
      %c0_i32_52 = arith.constant 0 : i32
      %109 = tpu.memref_slice %arg5[%66, %c4_i32_50, %c0_i32_52] : memref<2x8x128xf32, #tpu.memory_space<vmem>> -> memref<1x1x128xf32, #tpu.memory_space<vmem>>
      %110 = tpu.memref_squeeze %109 : memref<1x1x128xf32, #tpu.memory_space<vmem>> -> memref<128xf32, #tpu.memory_space<vmem>>
      %111 = tpu.memref_slice %arg6[%66] : memref<2x!tpu.dma_semaphore, #tpu.memory_space<semaphore_mem>> -> memref<1x!tpu.dma_semaphore, #tpu.memory_space<semaphore_mem>>
      %112 = tpu.memref_squeeze %111 : memref<1x!tpu.dma_semaphore, #tpu.memory_space<semaphore_mem>> -> memref<!tpu.dma_semaphore, #tpu.memory_space<semaphore_mem>>
      tpu.enqueue_dma source(%108 : memref<128xf32, #tpu.memory_space<any>>) target(%110 : memref<128xf32, #tpu.memory_space<vmem>>) target_semaphore(%112 : memref<!tpu.dma_semaphore, #tpu.memory_space<semaphore_mem>>)
      %c5_i32_53 = arith.constant 5 : i32
      %113 = arith.addi %67, %c5_i32_53 : i32
      %114 = arith.index_cast %113 : i32 to index
      %115 = memref.load %arg2[%114] : memref<32xi32, #tpu.memory_space<smem>>
      %c0_i32_54 = arith.constant 0 : i32
      %116 = tpu.memref_slice %arg3[%115, %c0_i32_54] : memref<64x128xf32, #tpu.memory_space<any>> -> memref<1x128xf32, #tpu.memory_space<any>>
      %117 = tpu.memref_squeeze %116 : memref<1x128xf32, #tpu.memory_space<any>> -> memref<128xf32, #tpu.memory_space<any>>
      %c0_i32_55 = arith.constant 0 : i32
      %118 = tpu.memref_slice %arg5[%66, %c5_i32_53, %c0_i32_55] : memref<2x8x128xf32, #tpu.memory_space<vmem>> -> memref<1x1x128xf32, #tpu.memory_space<vmem>>
      %119 = tpu.memref_squeeze %118 : memref<1x1x128xf32, #tpu.memory_space<vmem>> -> memref<128xf32, #tpu.memory_space<vmem>>
      %120 = tpu.memref_slice %arg6[%66] : memref<2x!tpu.dma_semaphore, #tpu.memory_space<semaphore_mem>> -> memref<1x!tpu.dma_semaphore, #tpu.memory_space<semaphore_mem>>
      %121 = tpu.memref_squeeze %120 : memref<1x!tpu.dma_semaphore, #tpu.memory_space<semaphore_mem>> -> memref<!tpu.dma_semaphore, #tpu.memory_space<semaphore_mem>>
      tpu.enqueue_dma source(%117 : memref<128xf32, #tpu.memory_space<any>>) target(%119 : memref<128xf32, #tpu.memory_space<vmem>>) target_semaphore(%121 : memref<!tpu.dma_semaphore, #tpu.memory_space<semaphore_mem>>)
      %c6_i32_56 = arith.constant 6 : i32
      %122 = arith.addi %67, %c6_i32_56 : i32
      %123 = arith.index_cast %122 : i32 to index
      %124 = memref.load %arg2[%123] : memref<32xi32, #tpu.memory_space<smem>>
      %c0_i32_57 = arith.constant 0 : i32
      %125 = tpu.memref_slice %arg3[%124, %c0_i32_57] : memref<64x128xf32, #tpu.memory_space<any>> -> memref<1x128xf32, #tpu.memory_space<any>>
      %126 = tpu.memref_squeeze %125 : memref<1x128xf32, #tpu.memory_space<any>> -> memref<128xf32, #tpu.memory_space<any>>
      %c0_i32_58 = arith.constant 0 : i32
      %127 = tpu.memref_slice %arg5[%66, %c6_i32_56, %c0_i32_58] : memref<2x8x128xf32, #tpu.memory_space<vmem>> -> memref<1x1x128xf32, #tpu.memory_space<vmem>>
      %128 = tpu.memref_squeeze %127 : memref<1x1x128xf32, #tpu.memory_space<vmem>> -> memref<128xf32, #tpu.memory_space<vmem>>
      %129 = tpu.memref_slice %arg6[%66] : memref<2x!tpu.dma_semaphore, #tpu.memory_space<semaphore_mem>> -> memref<1x!tpu.dma_semaphore, #tpu.memory_space<semaphore_mem>>
      %130 = tpu.memref_squeeze %129 : memref<1x!tpu.dma_semaphore, #tpu.memory_space<semaphore_mem>> -> memref<!tpu.dma_semaphore, #tpu.memory_space<semaphore_mem>>
      tpu.enqueue_dma source(%126 : memref<128xf32, #tpu.memory_space<any>>) target(%128 : memref<128xf32, #tpu.memory_space<vmem>>) target_semaphore(%130 : memref<!tpu.dma_semaphore, #tpu.memory_space<semaphore_mem>>)
      %c7_i32_59 = arith.constant 7 : i32
      %131 = arith.addi %67, %c7_i32_59 : i32
      %132 = arith.index_cast %131 : i32 to index
      %133 = memref.load %arg2[%132] : memref<32xi32, #tpu.memory_space<smem>>
      %c0_i32_60 = arith.constant 0 : i32
      %134 = tpu.memref_slice %arg3[%133, %c0_i32_60] : memref<64x128xf32, #tpu.memory_space<any>> -> memref<1x128xf32, #tpu.memory_space<any>>
      %135 = tpu.memref_squeeze %134 : memref<1x128xf32, #tpu.memory_space<any>> -> memref<128xf32, #tpu.memory_space<any>>
      %c0_i32_61 = arith.constant 0 : i32
      %136 = tpu.memref_slice %arg5[%66, %c7_i32_59, %c0_i32_61] : memref<2x8x128xf32, #tpu.memory_space<vmem>> -> memref<1x1x128xf32, #tpu.memory_space<vmem>>
      %137 = tpu.memref_squeeze %136 : memref<1x1x128xf32, #tpu.memory_space<vmem>> -> memref<128xf32, #tpu.memory_space<vmem>>
      %138 = tpu.memref_slice %arg6[%66] : memref<2x!tpu.dma_semaphore, #tpu.memory_space<semaphore_mem>> -> memref<1x!tpu.dma_semaphore, #tpu.memory_space<semaphore_mem>>
      %139 = tpu.memref_squeeze %138 : memref<1x!tpu.dma_semaphore, #tpu.memory_space<semaphore_mem>> -> memref<!tpu.dma_semaphore, #tpu.memory_space<semaphore_mem>>
      tpu.enqueue_dma source(%135 : memref<128xf32, #tpu.memory_space<any>>) target(%137 : memref<128xf32, #tpu.memory_space<vmem>>) target_semaphore(%139 : memref<!tpu.dma_semaphore, #tpu.memory_space<semaphore_mem>>)
      %c8_i32_62 = arith.constant 8 : i32
    } else {
    }
    %c0_i32_4 = arith.constant 0 : i32
    %c0_i32_5 = arith.constant 0 : i32
    %c0_i32_6 = arith.constant 0 : i32
    %10 = tpu.memref_slice %arg3[%c0_i32_5, %c0_i32_6] : memref<64x128xf32, #tpu.memory_space<any>> -> memref<1x128xf32, #tpu.memory_space<any>>
    %11 = tpu.memref_squeeze %10 : memref<1x128xf32, #tpu.memory_space<any>> -> memref<128xf32, #tpu.memory_space<any>>
    %c0_i32_7 = arith.constant 0 : i32
    %12 = tpu.memref_slice %arg5[%2, %c0_i32_4, %c0_i32_7] : memref<2x8x128xf32, #tpu.memory_space<vmem>> -> memref<1x1x128xf32, #tpu.memory_space<vmem>>
    %13 = tpu.memref_squeeze %12 : memref<1x1x128xf32, #tpu.memory_space<vmem>> -> memref<128xf32, #tpu.memory_space<vmem>>
    %14 = tpu.memref_slice %arg6[%2] : memref<2x!tpu.dma_semaphore, #tpu.memory_space<semaphore_mem>> -> memref<1x!tpu.dma_semaphore, #tpu.memory_space<semaphore_mem>>
    %15 = tpu.memref_squeeze %14 : memref<1x!tpu.dma_semaphore, #tpu.memory_space<semaphore_mem>> -> memref<!tpu.dma_semaphore, #tpu.memory_space<semaphore_mem>>
    tpu.wait_dma2 semaphore(%15 : memref<!tpu.dma_semaphore, #tpu.memory_space<semaphore_mem>>) src(%11 : memref<128xf32, #tpu.memory_space<any>>) dst(%13 : memref<128xf32, #tpu.memory_space<vmem>>)
    %c1_i32_8 = arith.constant 1 : i32
    %c0_i32_9 = arith.constant 0 : i32
    %c0_i32_10 = arith.constant 0 : i32
    %16 = tpu.memref_slice %arg3[%c0_i32_9, %c0_i32_10] : memref<64x128xf32, #tpu.memory_space<any>> -> memref<1x128xf32, #tpu.memory_space<any>>
    %17 = tpu.memref_squeeze %16 : memref<1x128xf32, #tpu.memory_space<any>> -> memref<128xf32, #tpu.memory_space<any>>
    %c0_i32_11 = arith.constant 0 : i32
    %18 = tpu.memref_slice %arg5[%2, %c1_i32_8, %c0_i32_11] : memref<2x8x128xf32, #tpu.memory_space<vmem>> -> memref<1x1x128xf32, #tpu.memory_space<vmem>>
    %19 = tpu.memref_squeeze %18 : memref<1x1x128xf32, #tpu.memory_space<vmem>> -> memref<128xf32, #tpu.memory_space<vmem>>
    %20 = tpu.memref_slice %arg6[%2] : memref<2x!tpu.dma_semaphore, #tpu.memory_space<semaphore_mem>> -> memref<1x!tpu.dma_semaphore, #tpu.memory_space<semaphore_mem>>
    %21 = tpu.memref_squeeze %20 : memref<1x!tpu.dma_semaphore, #tpu.memory_space<semaphore_mem>> -> memref<!tpu.dma_semaphore, #tpu.memory_space<semaphore_mem>>
    tpu.wait_dma2 semaphore(%21 : memref<!tpu.dma_semaphore, #tpu.memory_space<semaphore_mem>>) src(%17 : memref<128xf32, #tpu.memory_space<any>>) dst(%19 : memref<128xf32, #tpu.memory_space<vmem>>)
    %c2_i32_12 = arith.constant 2 : i32
    %c0_i32_13 = arith.constant 0 : i32
    %c0_i32_14 = arith.constant 0 : i32
    %22 = tpu.memref_slice %arg3[%c0_i32_13, %c0_i32_14] : memref<64x128xf32, #tpu.memory_space<any>> -> memref<1x128xf32, #tpu.memory_space<any>>
    %23 = tpu.memref_squeeze %22 : memref<1x128xf32, #tpu.memory_space<any>> -> memref<128xf32, #tpu.memory_space<any>>
    %c0_i32_15 = arith.constant 0 : i32
    %24 = tpu.memref_slice %arg5[%2, %c2_i32_12, %c0_i32_15] : memref<2x8x128xf32, #tpu.memory_space<vmem>> -> memref<1x1x128xf32, #tpu.memory_space<vmem>>
    %25 = tpu.memref_squeeze %24 : memref<1x1x128xf32, #tpu.memory_space<vmem>> -> memref<128xf32, #tpu.memory_space<vmem>>
    %26 = tpu.memref_slice %arg6[%2] : memref<2x!tpu.dma_semaphore, #tpu.memory_space<semaphore_mem>> -> memref<1x!tpu.dma_semaphore, #tpu.memory_space<semaphore_mem>>
    %27 = tpu.memref_squeeze %26 : memref<1x!tpu.dma_semaphore, #tpu.memory_space<semaphore_mem>> -> memref<!tpu.dma_semaphore, #tpu.memory_space<semaphore_mem>>
    tpu.wait_dma2 semaphore(%27 : memref<!tpu.dma_semaphore, #tpu.memory_space<semaphore_mem>>) src(%23 : memref<128xf32, #tpu.memory_space<any>>) dst(%25 : memref<128xf32, #tpu.memory_space<vmem>>)
    %c3_i32 = arith.constant 3 : i32
    %c0_i32_16 = arith.constant 0 : i32
    %c0_i32_17 = arith.constant 0 : i32
    %28 = tpu.memref_slice %arg3[%c0_i32_16, %c0_i32_17] : memref<64x128xf32, #tpu.memory_space<any>> -> memref<1x128xf32, #tpu.memory_space<any>>
    %29 = tpu.memref_squeeze %28 : memref<1x128xf32, #tpu.memory_space<any>> -> memref<128xf32, #tpu.memory_space<any>>
    %c0_i32_18 = arith.constant 0 : i32
    %30 = tpu.memref_slice %arg5[%2, %c3_i32, %c0_i32_18] : memref<2x8x128xf32, #tpu.memory_space<vmem>> -> memref<1x1x128xf32, #tpu.memory_space<vmem>>
    %31 = tpu.memref_squeeze %30 : memref<1x1x128xf32, #tpu.memory_space<vmem>> -> memref<128xf32, #tpu.memory_space<vmem>>
    %32 = tpu.memref_slice %arg6[%2] : memref<2x!tpu.dma_semaphore, #tpu.memory_space<semaphore_mem>> -> memref<1x!tpu.dma_semaphore, #tpu.memory_space<semaphore_mem>>
    %33 = tpu.memref_squeeze %32 : memref<1x!tpu.dma_semaphore, #tpu.memory_space<semaphore_mem>> -> memref<!tpu.dma_semaphore, #tpu.memory_space<semaphore_mem>>
    tpu.wait_dma2 semaphore(%33 : memref<!tpu.dma_semaphore, #tpu.memory_space<semaphore_mem>>) src(%29 : memref<128xf32, #tpu.memory_space<any>>) dst(%31 : memref<128xf32, #tpu.memory_space<vmem>>)
    %c4_i32 = arith.constant 4 : i32
    %c0_i32_19 = arith.constant 0 : i32
    %c0_i32_20 = arith.constant 0 : i32
    %34 = tpu.memref_slice %arg3[%c0_i32_19, %c0_i32_20] : memref<64x128xf32, #tpu.memory_space<any>> -> memref<1x128xf32, #tpu.memory_space<any>>
    %35 = tpu.memref_squeeze %34 : memref<1x128xf32, #tpu.memory_space<any>> -> memref<128xf32, #tpu.memory_space<any>>
    %c0_i32_21 = arith.constant 0 : i32
    %36 = tpu.memref_slice %arg5[%2, %c4_i32, %c0_i32_21] : memref<2x8x128xf32, #tpu.memory_space<vmem>> -> memref<1x1x128xf32, #tpu.memory_space<vmem>>
    %37 = tpu.memref_squeeze %36 : memref<1x1x128xf32, #tpu.memory_space<vmem>> -> memref<128xf32, #tpu.memory_space<vmem>>
    %38 = tpu.memref_slice %arg6[%2] : memref<2x!tpu.dma_semaphore, #tpu.memory_space<semaphore_mem>> -> memref<1x!tpu.dma_semaphore, #tpu.memory_space<semaphore_mem>>
    %39 = tpu.memref_squeeze %38 : memref<1x!tpu.dma_semaphore, #tpu.memory_space<semaphore_mem>> -> memref<!tpu.dma_semaphore, #tpu.memory_space<semaphore_mem>>
    tpu.wait_dma2 semaphore(%39 : memref<!tpu.dma_semaphore, #tpu.memory_space<semaphore_mem>>) src(%35 : memref<128xf32, #tpu.memory_space<any>>) dst(%37 : memref<128xf32, #tpu.memory_space<vmem>>)
    %c5_i32 = arith.constant 5 : i32
    %c0_i32_22 = arith.constant 0 : i32
    %c0_i32_23 = arith.constant 0 : i32
    %40 = tpu.memref_slice %arg3[%c0_i32_22, %c0_i32_23] : memref<64x128xf32, #tpu.memory_space<any>> -> memref<1x128xf32, #tpu.memory_space<any>>
    %41 = tpu.memref_squeeze %40 : memref<1x128xf32, #tpu.memory_space<any>> -> memref<128xf32, #tpu.memory_space<any>>
    %c0_i32_24 = arith.constant 0 : i32
    %42 = tpu.memref_slice %arg5[%2, %c5_i32, %c0_i32_24] : memref<2x8x128xf32, #tpu.memory_space<vmem>> -> memref<1x1x128xf32, #tpu.memory_space<vmem>>
    %43 = tpu.memref_squeeze %42 : memref<1x1x128xf32, #tpu.memory_space<vmem>> -> memref<128xf32, #tpu.memory_space<vmem>>
    %44 = tpu.memref_slice %arg6[%2] : memref<2x!tpu.dma_semaphore, #tpu.memory_space<semaphore_mem>> -> memref<1x!tpu.dma_semaphore, #tpu.memory_space<semaphore_mem>>
    %45 = tpu.memref_squeeze %44 : memref<1x!tpu.dma_semaphore, #tpu.memory_space<semaphore_mem>> -> memref<!tpu.dma_semaphore, #tpu.memory_space<semaphore_mem>>
    tpu.wait_dma2 semaphore(%45 : memref<!tpu.dma_semaphore, #tpu.memory_space<semaphore_mem>>) src(%41 : memref<128xf32, #tpu.memory_space<any>>) dst(%43 : memref<128xf32, #tpu.memory_space<vmem>>)
    %c6_i32 = arith.constant 6 : i32
    %c0_i32_25 = arith.constant 0 : i32
    %c0_i32_26 = arith.constant 0 : i32
    %46 = tpu.memref_slice %arg3[%c0_i32_25, %c0_i32_26] : memref<64x128xf32, #tpu.memory_space<any>> -> memref<1x128xf32, #tpu.memory_space<any>>
    %47 = tpu.memref_squeeze %46 : memref<1x128xf32, #tpu.memory_space<any>> -> memref<128xf32, #tpu.memory_space<any>>
    %c0_i32_27 = arith.constant 0 : i32
    %48 = tpu.memref_slice %arg5[%2, %c6_i32, %c0_i32_27] : memref<2x8x128xf32, #tpu.memory_space<vmem>> -> memref<1x1x128xf32, #tpu.memory_space<vmem>>
    %49 = tpu.memref_squeeze %48 : memref<1x1x128xf32, #tpu.memory_space<vmem>> -> memref<128xf32, #tpu.memory_space<vmem>>
    %50 = tpu.memref_slice %arg6[%2] : memref<2x!tpu.dma_semaphore, #tpu.memory_space<semaphore_mem>> -> memref<1x!tpu.dma_semaphore, #tpu.memory_space<semaphore_mem>>
    %51 = tpu.memref_squeeze %50 : memref<1x!tpu.dma_semaphore, #tpu.memory_space<semaphore_mem>> -> memref<!tpu.dma_semaphore, #tpu.memory_space<semaphore_mem>>
    tpu.wait_dma2 semaphore(%51 : memref<!tpu.dma_semaphore, #tpu.memory_space<semaphore_mem>>) src(%47 : memref<128xf32, #tpu.memory_space<any>>) dst(%49 : memref<128xf32, #tpu.memory_space<vmem>>)
    %c7_i32 = arith.constant 7 : i32
    %c0_i32_28 = arith.constant 0 : i32
    %c0_i32_29 = arith.constant 0 : i32
    %52 = tpu.memref_slice %arg3[%c0_i32_28, %c0_i32_29] : memref<64x128xf32, #tpu.memory_space<any>> -> memref<1x128xf32, #tpu.memory_space<any>>
    %53 = tpu.memref_squeeze %52 : memref<1x128xf32, #tpu.memory_space<any>> -> memref<128xf32, #tpu.memory_space<any>>
    %c0_i32_30 = arith.constant 0 : i32
    %54 = tpu.memref_slice %arg5[%2, %c7_i32, %c0_i32_30] : memref<2x8x128xf32, #tpu.memory_space<vmem>> -> memref<1x1x128xf32, #tpu.memory_space<vmem>>
    %55 = tpu.memref_squeeze %54 : memref<1x1x128xf32, #tpu.memory_space<vmem>> -> memref<128xf32, #tpu.memory_space<vmem>>
    %56 = tpu.memref_slice %arg6[%2] : memref<2x!tpu.dma_semaphore, #tpu.memory_space<semaphore_mem>> -> memref<1x!tpu.dma_semaphore, #tpu.memory_space<semaphore_mem>>
    %57 = tpu.memref_squeeze %56 : memref<1x!tpu.dma_semaphore, #tpu.memory_space<semaphore_mem>> -> memref<!tpu.dma_semaphore, #tpu.memory_space<semaphore_mem>>
    tpu.wait_dma2 semaphore(%57 : memref<!tpu.dma_semaphore, #tpu.memory_space<semaphore_mem>>) src(%53 : memref<128xf32, #tpu.memory_space<any>>) dst(%55 : memref<128xf32, #tpu.memory_space<vmem>>)
    %c8_i32 = arith.constant 8 : i32
    %58 = arith.index_cast %2 : i32 to index
    %c0 = arith.constant 0 : index
    %c0_31 = arith.constant 0 : index
    %59 = vector.load %arg5[%58, %c0, %c0_31] : memref<2x8x128xf32, #tpu.memory_space<vmem>>, vector<1x8x128xf32>
    %60 = vector.shape_cast %59 : vector<1x8x128xf32> to vector<8x128xf32>
    %cst = arith.constant 11.3137083 : f32
    %61 = vector.broadcast %cst : f32 to vector<8x128xf32>
    %62 = arith.mulf %60, %61 : vector<8x128xf32>
    %c0_32 = arith.constant 0 : index
    %c0_33 = arith.constant 0 : index
    %63 = vector.load %arg4[%c0_32, %c0_33] : memref<8x128xf32, #tpu.memory_space<vmem>>, vector<8x128xf32>
    tpu.vector_store %arg4[%c0_32, %c0_33], %62 {strides = array<i32>} : memref<8x128xf32, #tpu.memory_space<vmem>>, vector<8x128xf32>,
    return
  }
  func.func @transform_1(%arg0: i32, %arg1: i32, %arg2: memref<32xi32, #tpu.memory_space<smem>>) -> (i32, i32) {
    %c2_i32 = arith.constant 2 : i32
    %0 = arith.muli %arg0, %c2_i32 : i32
    %1 = arith.addi %0, %arg1 : i32
    %c0_i32 = arith.constant 0 : i32
    %c0_i32_0 = arith.constant 0 : i32
    return %1, %c0_i32 : i32, i32
  }
}

</mosaic_0001>

<bundles_post_ra>
// kernel: tpu_custom_call.1
= control target key start
LH: loop header
LB: loop body
LE: loop exit
PB: predicated region body
PF: predicated region fallthrough
CT: control target
= control target key end

     0   :  { %s1846_s0 = inlined_call_operand.hbm [shape: s32[32], index: 0, kind: input, shape index: {}]   ;;  %s1847_s1 = inlined_call_operand.hbm [shape: f32[64,128], index: 1, kind: input, shape index: {}]   ;;  %s1848_s2 = inlined_call_operand.hbm [shape: f32[32,128], index: 2, kind: output, shape index: {}]  }
   0x1   :  { %s660_s11 = scalar_lea.hbm %s1846_s0, 16 }
   0x2   :  { %p661_p0 = scmp.ne.s32.totalorder %s1846_s0, %s660_s11  ;;  %p664_p1 = scmp.lt.u32.totalorder %s660_s11, %s1846_s0 }
   0x4   :  { %p666_p2 = pnand %p664_p1, %p661_p0 }
   0x6   :  { %669 = shalt.err (!%p666_p2)  }
   0x7   :  { %s1194_s16 = smov [#allocation5]  }
   0x8   :  { %8 = dma.hbm_to_smem %s1846_s0, 16, %s1194_s16, [#allocation4] }
   0x9   :  { %1166 = dma.done.wait [#allocation4], 16 }
   0xa   :  { %1167 = vsyncadd [#allocation4], 4294967280 }
   0xb   :  { %10 = sfence }
   0xc   :  { %11 = vsyncpa [#allocation7], 0 }
   0xd   :  { %13 = vsyncpa [#allocation7 + $0x1], 0  ;;  %s1231_s19 = smov 0   ;;  %s1233_s20 = smov 0  }
   0xe   :  { %s1235_s21 = smov 0   ;;  %s1237_s22 = smov 0  }
   0xf   :  { %s1239_s23 = smov 0  }
  0x10 LB: > { %s1255_s0 = sadd.s32 1, %s1184_s21  ;;  %s28_s24 = sadd.s32 1, %s1188_s22  ;;  %s1192_s23 = sphi %s1239_s23, %s19_s23   ;;  %s1188_s22 = sphi %s1237_s22, %s1908_s22   ;;  %s1184_s21 = sphi %s1235_s21, %s1907_s21   ;;  %s1180_s20 = sphi %s1233_s20, %s1910_s20   ;;  %s1176_s19 = sphi %s1231_s19, %s1909_s19  }
  0x11   : > { %p26_p3 = scmp.ge.s32.totalorder %s1255_s0, 2  ;;  %s507_s25 = sadd.s32 4294967295, %s1192_s23  }
  0x12   : > { %s508_s26 = sshll.u32 %s1188_s22, 1  ;;  %p48_p5 = scmp.ne.s32.totalorder %s1180_s20, %s1176_s19 }
  0x13   : > { %s1912_s24 = smov (!%p26_p3, %s28_s24), %s1188_s22  ;;  %p49_p6 = scmp.eq.s32.totalorder %s507_s25, 3 }
  0x14   : > { %s1260_s27 = scalar_select %p26_p3, 0, %s1255_s0  }
  0x15   : > { %p30_p4 = scmp.ge.s32.totalorder %s1912_s24, 2  ;;  %s1267_s28 = sadd.s32 %s1184_s21, %s508_s26 }
  0x16   : > { %1855 = sst [smem:[#allocation61_spill]] %s1260_s27  ;;  %p1269_p7 = por %p49_p6, %p48_p5 }
  0x17   : > { %s1914_s24 = smov (%p30_p4, %s1912_s24), 0  ;;  %s39_s4 = sadd.s32 1, %s1180_s20 }
  0x18   : > { %1856 = sst [smem:[#allocation62_spill]] %s1914_s24  ;;  %s509_s30 = sshll.u32 %s1914_s24, 1 }
  0x19   : > { %s1857_s29 = scalar_select %p1269_p7, 1, 0 }
  0x1a   : > { %s35_s3 = sadd.s32 %s509_s30, %s1260_s27  ;;  %p43_p8 = scmp.eq.s32.totalorder %s1192_s23, 3 }
  0x1b   : > { %1858 = sst [smem:[#allocation63_spill]] %s1857_s29  ;;  %s36_s5 = ssub.s32 %s1267_s28, %s35_s3 }
  0x1c   : > { %p37_p9 = scmp.eq.s32.totalorder %s36_s5, 0  ;;  %p510_p10 = scmp.ne.s32.totalorder %s36_s5, 0 }
  0x1d   : > { %p511_p12 = scmp.ge.s32.totalorder %s1192_s23, 4 }
  0x1e   : > { %s1279_s6 = scalar_select %p37_p9, %s1180_s20, %s39_s4  }
  0x1f   : > { %p1281_p11 = por %p510_p10, %p43_p8  ;;  %58 = sbr.rel (%p511_p12) target bundleno = 502 (0x1f6), region = 12 }
  0x20   : > { %1859 = sst [smem:[#allocation64_spill]] %s1279_s6  ;;  %s1849_s8 = sand.u32 (!%p511_p12), 1, %s1180_s20  }
  0x21   : > { %s1860_s7 = scalar_select %p1281_p11, 1, 0 }
  0x22   : > { %s1290_s10 = sshll.u32 (!%p511_p12), %s1849_s8, 3  ;;  %p608_p13 = scmp.eq.s32.totalorder (!%p511_p12), %s1184_s21, 0 }
  0x23   : > { %s1294_s11 = sshll.u32 (!%p511_p12), %s1267_s28, 3  ;;  %s1195_s14 = smov (!%p511_p12), [#allocation2]  }
  0x24   : > { %s86_s15 = sshll.u32 (!%p511_p12), %s1195_s14, 4  ;;  %s90_s16 = sadd.s32 (!%p511_p12), 1, %s1294_s11  ;;  %s1302_s15 = int_to_ptr.vmem [resolvable:$true] %s86_s15 }
  0x25   : > { %s1196_s26 = smov (!%p511_p12), [#allocation2 + $0x1]   ;;  %s1197_s4 = smov (!%p511_p12), [#allocation2 + $0x2]  }
  0x26   : > { %s553_s12 = scalar_select %p608_p13, [#allocation5], [#allocation42] }
  0x27   : > { %s554_s13 = scalar_select %p608_p13, %s1294_s11, 0 }
  0x28   : > { %s556_s18 = scalar_select %p608_p13, [#allocation5], [#allocation43] }
  0x29   : > { %s76_s17 = sld [smem:[%s553_s12 + %s554_s13]]  ;;  %s1916_s16 = smov (!%p608_p13, %s90_s16), 0 }
  0x2a   : > { %s1309_s25 = sld [smem:[%s556_s18 + %s1916_s16]]  ;;  %s102_s30 = sshll.u32 %s1196_s26, 4  ;;  %s1311_s30 = int_to_ptr.vmem [resolvable:$true] %s102_s30 }
  0x2b   : > { %s118_s5 = sshll.u32 %s1197_s4, 4  ;;  %s1323_s26 = scalar_lea.hbm %s1847_s1, 1024  ;;  %s1316_s5 = int_to_ptr.vmem [resolvable:$true] %s118_s5 }
  0x2f   : > { %s516_s3 = sshll.u32 %s76_s17, 4 }
  0x30   : > { %s78_s12 = scalar_lea.hbm %s1847_s1, %s516_s3 }
  0x31   : > { %s670_s13 = scalar_lea.hbm %s78_s12, 16  ;;  %p675_p3 = scmp.lt.u32.totalorder %s78_s12, %s1847_s1 }
  0x32   : > { %p671_p0 = scmp.ne.s32.totalorder %s78_s12, %s670_s13  ;;  %p676_p4 = scmp.lt.u32.totalorder %s1323_s26, %s670_s13 }
  0x33   : > { %p678_p6 = scmp.lt.u32.totalorder %s670_s13, %s78_s12 }
  0x34   : > { %p672_p1 = pnand %p671_p0, %p608_p13  ;;  %p677_p5 = por %p676_p4, %p675_p3 }
  0x36   : > { %p673_p2 = pneg %p672_p1  ;;  %p679_p8 = por %p678_p6, %p677_p5 }
  0x38   : > { %p680_p9 = pnand %p679_p8, %p673_p2 }
  0x3a   : > { %683 = shalt.err (!%p680_p9)  }
  0x3b   : > { %s684_s8 = scalar_lea.vmem %s1302_s15, 16  ;;  %s1334_s3 = scalar_lea.vmem %s1302_s15, 256 }
  0x3c   : > { %p685_p10 = scmp.ne.s32.totalorder %s1302_s15, %s684_s8  ;;  %p691_p1 = scmp.lt.s32.totalorder %s1302_s15, %s1302_s15 }
  0x3d   : > { %p692_p3 = scmp.lt.s32.totalorder %s1334_s3, %s684_s8 }
  0x3e   : > { %p686_p12 = pnand %p685_p10, %p608_p13 }
  0x3f   : > { %p693_p4 = por %p692_p3, %p691_p1 }
  0x40   : > { %p687_p0 = pneg %p686_p12 }
  0x42   : > { %p694_p5 = pnand %p693_p4, %p687_p0 }
  0x44   : > { %697 = shalt.err (!%p694_p5)  }
  0x45   : > { %555 = dma.hbm_to_vmem [thread:$0]  (%p608_p13), %s78_s12, 16, %s1302_s15, [#allocation3] }
  0x46   : > { %s559_s9 = scalar_select %p608_p13, [#allocation5], [#allocation44] }
  0x47   : > { %s517_s4 = sshll.u32 %s1309_s25, 4  ;;  %s122_s14 = sadd.s32 3, %s1294_s11 }
  0x48   : > { %s93_s18 = scalar_lea.hbm %s1847_s1, %s517_s4 }
  0x49   : > { %s698_s17 = scalar_lea.hbm %s93_s18, 16  ;;  %p703_p9 = scmp.lt.u32.totalorder %s93_s18, %s1847_s1 }
  0x4a   : > { %p699_p2 = scmp.ne.s32.totalorder %s93_s18, %s698_s17  ;;  %p704_p10 = scmp.lt.u32.totalorder %s1323_s26, %s698_s17 }
  0x4b   : > { %p706_p0 = scmp.lt.u32.totalorder %s698_s17, %s93_s18 }
  0x4c   : > { %p700_p6 = pnand %p699_p2, %p608_p13  ;;  %p705_p12 = por %p704_p10, %p703_p9 }
  0x4e   : > { %p701_p8 = pneg %p700_p6  ;;  %p707_p1 = por %p706_p0, %p705_p12 }
  0x50   : > { %p708_p3 = pnand %p707_p1, %p701_p8 }
  0x52   : > { %711 = shalt.err (!%p708_p3)  }
  0x53   : > { %s712_s25 = scalar_lea.vmem %s1311_s30, 16  ;;  %p719_p6 = scmp.lt.s32.totalorder %s1311_s30, %s1302_s15 }
  0x54   : > { %p713_p4 = scmp.ne.s32.totalorder %s1311_s30, %s712_s25  ;;  %p720_p7 = scmp.lt.s32.totalorder %s1334_s3, %s712_s25 }
  0x56   : > { %p714_p5 = pnand %p713_p4, %p608_p13  ;;  %p721_p11 = por %p720_p7, %p719_p6 }
  0x58   : > { %p715_p2 = pneg %p714_p5 }
  0x5a   : > { %p722_p9 = pnand %p721_p11, %p715_p2 }
  0x5c   : > { %725 = shalt.err (!%p722_p9)  }
  0x5d   : > { %558 = dma.hbm_to_vmem [thread:$0]  (%p608_p13), %s93_s18, 16, %s1311_s30, [#allocation3] }
  0x5e   : > { %s1861_s22 = sadd.s32 2, %s1294_s11  ;;  %s1198_s13 = smov [#allocation2 + $0x3]  }
  0x5f   : > { %s1918_s22 = smov (!%p608_p13, %s1861_s22), 0  ;;  %s134_s16 = sshll.u32 %s1198_s13, 4  ;;  %s1373_s16 = int_to_ptr.vmem [resolvable:$true] %s134_s16 }
  0x60   : > { %s562_s12 = scalar_select %p608_p13, [#allocation5], [#allocation45] }
  0x61   : > { %s107_s4 = sld [smem:[%s559_s9 + %s1918_s22]]  ;;  %s1920_s14 = smov (!%p608_p13, %s122_s14), 0 }
  0x62   : > { %s138_s17 = sadd.s32 4, %s1294_s11  ;;  %s1376_s8 = sld [smem:[%s562_s12 + %s1920_s14]] }
  0x63   : > { %s565_s25 = scalar_select %p608_p13, [#allocation5], [#allocation46] }
  0x64   : > { %s1922_s17 = smov (!%p608_p13, %s138_s17), 0  ;;  %s1199_s18 = smov [#allocation2 + $0x4]  }
  0x65   : > { %s150_s24 = sshll.u32 %s1199_s18, 4  ;;  %s1385_s13 = sld [smem:[%s565_s25 + %s1922_s17]]  ;;  %s1404_s24 = int_to_ptr.vmem [resolvable:$true] %s150_s24 }
  0x67   : > { %s518_s30 = sshll.u32 %s107_s4, 4 }
  0x68   : > { %s109_s22 = scalar_lea.hbm %s1847_s1, %s518_s30 }
  0x69   : > { %s726_s6 = scalar_lea.hbm %s109_s22, 16  ;;  %p731_p10 = scmp.lt.u32.totalorder %s109_s22, %s1847_s1 }
  0x6a   : > { %p727_p7 = scmp.ne.s32.totalorder %s109_s22, %s726_s6  ;;  %p732_p12 = scmp.lt.u32.totalorder %s1323_s26, %s726_s6 }
  0x6b   : > { %p734_p1 = scmp.lt.u32.totalorder %s726_s6, %s109_s22 }
  0x6c   : > { %p728_p11 = pnand %p727_p7, %p608_p13  ;;  %p733_p0 = por %p732_p12, %p731_p10 }
  0x6e   : > { %p729_p8 = pneg %p728_p11  ;;  %p735_p3 = por %p734_p1, %p733_p0 }
  0x70   : > { %p736_p4 = pnand %p735_p3, %p729_p8 }
  0x72   : > { %739 = shalt.err (!%p736_p4)  }
  0x73   : > { %s740_s27 = scalar_lea.vmem %s1316_s5, 16  ;;  %p747_p9 = scmp.lt.s32.totalorder %s1316_s5, %s1302_s15 }
  0x74   : > { %p741_p5 = scmp.ne.s32.totalorder %s1316_s5, %s740_s27  ;;  %p748_p7 = scmp.lt.s32.totalorder %s1334_s3, %s740_s27 }
  0x76   : > { %p742_p2 = pnand %p741_p5, %p608_p13  ;;  %p749_p11 = por %p748_p7, %p747_p9 }
  0x78   : > { %p743_p6 = pneg %p742_p2 }
  0x7a   : > { %p750_p10 = pnand %p749_p11, %p743_p6 }
  0x7c   : > { %753 = shalt.err (!%p750_p10)  }
  0x7d   : > { %561 = dma.hbm_to_vmem [thread:$0]  (%p608_p13), %s109_s22, 16, %s1316_s5, [#allocation3] }
  0x7e   : > { %s519_s6 = sshll.u32 %s1376_s8, 4  ;;  %s154_s30 = sadd.s32 5, %s1294_s11 }
  0x7f   : > { %s125_s25 = scalar_lea.hbm %s1847_s1, %s519_s6 }
  0x80   : > { %s754_s18 = scalar_lea.hbm %s125_s25, 16  ;;  %p759_p1 = scmp.lt.u32.totalorder %s125_s25, %s1847_s1 }
  0x81   : > { %p755_p8 = scmp.ne.s32.totalorder %s125_s25, %s754_s18  ;;  %p760_p3 = scmp.lt.u32.totalorder %s1323_s26, %s754_s18 }
  0x82   : > { %p762_p5 = scmp.lt.u32.totalorder %s754_s18, %s125_s25 }
  0x83   : > { %p756_p12 = pnand %p755_p8, %p608_p13  ;;  %p761_p4 = por %p760_p3, %p759_p1 }
  0x85   : > { %p757_p0 = pneg %p756_p12  ;;  %p763_p2 = por %p762_p5, %p761_p4 }
  0x87   : > { %p764_p6 = pnand %p763_p2, %p757_p0 }
  0x89   : > { %767 = shalt.err (!%p764_p6)  }
  0x8a   : > { %s768_s5 = scalar_lea.vmem %s1373_s16, 16  ;;  %p775_p10 = scmp.lt.s32.totalorder %s1373_s16, %s1302_s15 }
  0x8b   : > { %p769_p9 = scmp.ne.s32.totalorder %s1373_s16, %s768_s5  ;;  %p776_p8 = scmp.lt.s32.totalorder %s1334_s3, %s768_s5 }
  0x8d   : > { %p770_p7 = pnand %p769_p9, %p608_p13  ;;  %p777_p12 = por %p776_p8, %p775_p10 }
  0x8f   : > { %p771_p11 = pneg %p770_p7 }
  0x91   : > { %p778_p1 = pnand %p777_p12, %p771_p11 }
  0x93   : > { %781 = shalt.err (!%p778_p1)  }
  0x94   : > { %564 = dma.hbm_to_vmem [thread:$0]  (%p608_p13), %s125_s25, 16, %s1373_s16, [#allocation3] }
  0x95   : > { %s1428_s8 = scalar_select %p608_p13, [#allocation5], [#allocation47] }
  0x96   : > { %s520_s22 = sshll.u32 %s1385_s13, 4  ;;  %s1200_s4 = smov [#allocation2 + $0x5]  }
  0x97   : > { %s141_s6 = scalar_lea.hbm %s1847_s1, %s520_s22  ;;  %s166_s17 = sshll.u32 %s1200_s4, 4  ;;  %s1454_s17 = int_to_ptr.vmem [resolvable:$true] %s166_s17 }
  0x98   : > { %s782_s18 = scalar_lea.hbm %s141_s6, 16  ;;  %p787_p5 = scmp.lt.u32.totalorder %s141_s6, %s1847_s1 }
  0x99   : > { %p783_p0 = scmp.ne.s32.totalorder %s141_s6, %s782_s18  ;;  %p788_p2 = scmp.lt.u32.totalorder %s1323_s26, %s782_s18 }
  0x9a   : > { %p790_p9 = scmp.lt.u32.totalorder %s782_s18, %s141_s6 }
  0x9b   : > { %p784_p3 = pnand %p783_p0, %p608_p13  ;;  %p789_p6 = por %p788_p2, %p787_p5 }
  0x9d   : > { %p785_p4 = pneg %p784_p3  ;;  %p791_p7 = por %p790_p9, %p789_p6 }
  0x9f   : > { %p792_p11 = pnand %p791_p7, %p785_p4 }
  0xa1   : > { %795 = shalt.err (!%p792_p11)  }
  0xa2   : > { %s796_s16 = scalar_lea.vmem %s1404_s24, 16  ;;  %p803_p1 = scmp.lt.s32.totalorder %s1404_s24, %s1302_s15 }
  0xa3   : > { %p797_p10 = scmp.ne.s32.totalorder %s1404_s24, %s796_s16  ;;  %p804_p0 = scmp.lt.s32.totalorder %s1334_s3, %s796_s16 }
  0xa5   : > { %p798_p8 = pnand %p797_p10, %p608_p13  ;;  %p805_p3 = por %p804_p0, %p803_p1 }
  0xa7   : > { %p799_p12 = pneg %p798_p8 }
  0xa9   : > { %p806_p2 = pnand %p805_p3, %p799_p12 }
  0xab   : > { %809 = shalt.err (!%p806_p2)  }
  0xac   : > { %567 = dma.hbm_to_vmem [thread:$0]  (%p608_p13), %s141_s6, 16, %s1404_s24, [#allocation3] }
  0xad   : > { %s1924_s30 = smov (!%p608_p13, %s154_s30), 0  ;;  %s170_s13 = sadd.s32 6, %s1294_s11 }
  0xae   : > { %s155_s25 = sld [smem:[%s1428_s8 + %s1924_s30]]  ;;  %s1926_s13 = smov (!%p608_p13, %s170_s13), 0 }
  0xaf   : > { %s571_s5 = scalar_select %p608_p13, [#allocation5], [#allocation48] }
  0xb0   : > { %s1201_s22 = smov [#allocation2 + $0x6]   ;;  %s186_s27 = sadd.s32 7, %s1294_s11 }
  0xb1   : > { %s182_s12 = sshll.u32 %s1201_s22, 4  ;;  %s1463_s4 = sld [smem:[%s571_s5 + %s1926_s13]]  ;;  %s1465_s12 = int_to_ptr.vmem [resolvable:$true] %s182_s12 }
  0xb2   : > { %s1469_s24 = scalar_select %p608_p13, [#allocation5], [#allocation49] }
  0xb3   : > { %s1202_s8 = smov [#allocation2 + $0x7]  }
  0xb4   : > { %s521_s6 = sshll.u32 %s155_s25, 4  ;;  %s198_s14 = sshll.u32 %s1202_s8, 4  ;;  %s1495_s14 = int_to_ptr.vmem [resolvable:$true] %s198_s14 }
  0xb5   : > { %s157_s30 = scalar_lea.hbm %s1847_s1, %s521_s6 }
  0xb6   : > { %s810_s16 = scalar_lea.hbm %s157_s30, 16  ;;  %p815_p9 = scmp.lt.u32.totalorder %s157_s30, %s1847_s1 }
  0xb7   : > { %p811_p4 = scmp.ne.s32.totalorder %s157_s30, %s810_s16  ;;  %p816_p7 = scmp.lt.u32.totalorder %s1323_s26, %s810_s16 }
  0xb8   : > { %p818_p10 = scmp.lt.u32.totalorder %s810_s16, %s157_s30 }
  0xb9   : > { %p812_p5 = pnand %p811_p4, %p608_p13  ;;  %p817_p11 = por %p816_p7, %p815_p9 }
  0xbb   : > { %p813_p6 = pneg %p812_p5  ;;  %p819_p8 = por %p818_p10, %p817_p11 }
  0xbd   : > { %p820_p12 = pnand %p819_p8, %p813_p6 }
  0xbf   : > { %823 = shalt.err (!%p820_p12)  }
  0xc0   : > { %s824_s25 = scalar_lea.vmem %s1454_s17, 16  ;;  %p831_p2 = scmp.lt.s32.totalorder %s1454_s17, %s1302_s15 }
  0xc1   : > { %p825_p1 = scmp.ne.s32.totalorder %s1454_s17, %s824_s25  ;;  %p832_p4 = scmp.lt.s32.totalorder %s1334_s3, %s824_s25 }
  0xc3   : > { %p826_p0 = pnand %p825_p1, %p608_p13  ;;  %p833_p5 = por %p832_p4, %p831_p2 }
  0xc5   : > { %p827_p3 = pneg %p826_p0 }
  0xc7   : > { %p834_p7 = pnand %p833_p5, %p827_p3 }
  0xc9   : > { %837 = shalt.err (!%p834_p7)  }
  0xca   : > { %570 = dma.hbm_to_vmem [thread:$0]  (%p608_p13), %s157_s30, 16, %s1454_s17, [#allocation3] }
  0xcb   : > { %s1928_s27 = smov (!%p608_p13, %s186_s27), 0  ;;  %s522_s5 = sshll.u32 %s1463_s4, 4 }
  0xcc   : > { %s173_s9 = scalar_lea.hbm %s1847_s1, %s522_s5  ;;  %s1501_s8 = sld [smem:[%s1469_s24 + %s1928_s27]] }
  0xcd   : > { %s838_s16 = scalar_lea.hbm %s173_s9, 16  ;;  %p843_p10 = scmp.lt.u32.totalorder %s173_s9, %s1847_s1 }
  0xce   : > { %p839_p6 = scmp.ne.s32.totalorder %s173_s9, %s838_s16  ;;  %p844_p8 = scmp.lt.u32.totalorder %s1323_s26, %s838_s16 }
  0xcf   : > { %p846_p1 = scmp.lt.u32.totalorder %s838_s16, %s173_s9 }
  0xd0   : > { %p840_p9 = pnand %p839_p6, %p608_p13  ;;  %p845_p12 = por %p844_p8, %p843_p10 }
  0xd2   : > { %p841_p11 = pneg %p840_p9  ;;  %p847_p0 = por %p846_p1, %p845_p12 }
  0xd4   : > { %p848_p3 = pnand %p847_p0, %p841_p11 }
  0xd6   : > { %851 = shalt.err (!%p848_p3)  }
  0xd7   : > { %s852_s17 = scalar_lea.vmem %s1465_s12, 16  ;;  %p859_p7 = scmp.lt.s32.totalorder %s1465_s12, %s1302_s15 }
  0xd8   : > { %p853_p2 = scmp.ne.s32.totalorder %s1465_s12, %s852_s17  ;;  %p860_p6 = scmp.lt.s32.totalorder %s1334_s3, %s852_s17 }
  0xda   : > { %p854_p4 = pnand %p853_p2, %p608_p13  ;;  %p861_p9 = por %p860_p6, %p859_p7 }
  0xdc   : > { %p855_p5 = pneg %p854_p4 }
  0xde   : > { %p862_p8 = pnand %p861_p9, %p855_p5 }
  0xe0   : > { %865 = shalt.err (!%p862_p8)  }
  0xe1   : > { %573 = dma.hbm_to_vmem [thread:$0]  (%p608_p13), %s173_s9, 16, %s1465_s12, [#allocation3] }
  0xe2   : > { %p1853_p11 = scmp.lt.s32.totalorder %s1255_s0, 2  ;;  %s208_s27 = sand.u32 1, %s1255_s0 }
  0xe3   : > { %s1522_s4 = sadd.s32 8, %s1294_s11  ;;  %s527_s24 = sshll.u32 %s208_s27, 3 }
  0xe4   : > { %s578_s30 = scalar_select %p1853_p11, [#allocation5], [#allocation50] }
  0xe5   : > { %s579_s25 = scalar_select %p1853_p11, %s1522_s4, 0 }
  0xe6   : > { %s523_s5 = sshll.u32 %s1501_s8, 4 }
  0xe7   : > { %s189_s16 = scalar_lea.hbm %s1847_s1, %s523_s5  ;;  %s1535_s22 = sld [smem:[%s578_s30 + %s579_s25]] }
  0xe8   : > { %s866_s13 = scalar_lea.hbm %s189_s16, 16  ;;  %p871_p0 = scmp.lt.u32.totalorder %s189_s16, %s1847_s1 }
  0xe9   : > { %p867_p10 = scmp.ne.s32.totalorder %s189_s16, %s866_s13  ;;  %p872_p3 = scmp.lt.u32.totalorder %s1323_s26, %s866_s13 }
  0xea   : > { %p874_p4 = scmp.lt.u32.totalorder %s866_s13, %s189_s16 }
  0xeb   : > { %p868_p12 = pnand %p867_p10, %p608_p13  ;;  %p873_p2 = por %p872_p3, %p871_p0 }
  0xed   : > { %p869_p1 = pneg %p868_p12  ;;  %p875_p5 = por %p874_p4, %p873_p2 }
  0xef   : > { %p876_p7 = pnand %p875_p5, %p869_p1 }
  0xf1   : > { %879 = shalt.err (!%p876_p7)  }
  0xf2   : > { %s880_s9 = scalar_lea.vmem %s1495_s14, 16  ;;  %p887_p10 = scmp.lt.s32.totalorder %s1495_s14, %s1302_s15 }
  0xf3   : > { %p881_p6 = scmp.ne.s32.totalorder %s1495_s14, %s880_s9  ;;  %p888_p12 = scmp.lt.s32.totalorder %s1334_s3, %s880_s9 }
  0xf5   : > { %p882_p9 = pnand %p881_p6, %p608_p13  ;;  %p889_p11 = por %p888_p12, %p887_p10 }
  0xf7   : > { %p883_p8 = pneg %p882_p9 }
  0xf9   : > { %p890_p0 = pnand %p889_p11, %p883_p8 }
  0xfb   : > { %893 = shalt.err (!%p890_p0)  }
  0xfc   : > { %576 = dma.hbm_to_vmem [thread:$0]  (%p608_p13), %s189_s16, 16, %s1495_s14, [#allocation3] }
  0xfd   : > { %s1553_s8 = scalar_lea.vmem [#allocation2], %s527_s24  ;;  %s227_s30 = sadd.s32 1, %s1522_s4 }
  0xfe   : > { %s223_s17 = sshll.u32 %s1553_s8, 4  ;;  %p1862_p11 = scmp.lt.s32.totalorder %s1255_s0, 2  ;;  %s1556_s17 = int_to_ptr.vmem [resolvable:$true] %s223_s17 }
  0xff   : > { %s526_s5 = sshll.u32 %s1535_s22, 4  ;;  %s446_s6 = scalar_lea.vmem %s1553_s8, 1 [#allocation2] }
 0x100   : > { %s581_s25 = scalar_select %p1862_p11, [#allocation5], [#allocation51] }
 0x101   : > { %p1863_p1 = pmov %p1862_p11  ;;  %s212_s11 = scalar_lea.hbm %s1847_s1, %s526_s5 }
 0x102   : > { %s1572_s24 = scalar_lea.sflag [#allocation3], %s208_s27  ;;  %s894_s16 = scalar_lea.hbm %s212_s11, 16 }
 0x103   : > { %s1930_s30 = smov (!%p1863_p1, %s227_s30), 0  ;;  %p895_p13 = scmp.ne.s32.totalorder %s212_s11, %s894_s16 }
 0x104   : > { %s1568_s14 = sld [smem:[%s581_s25 + %s1930_s30]]  ;;  %p1864_p3 = pmov %p1863_p1 }
 0x105   : > { %p899_p5 = scmp.lt.u32.totalorder %s212_s11, %s1847_s1  ;;  %p900_p7 = scmp.lt.u32.totalorder %s1323_s26, %s894_s16 }
 0x106   : > { %p896_p2 = pnand %p895_p13, %p1864_p3  ;;  %p902_p9 = scmp.lt.u32.totalorder %s894_s16, %s212_s11 }
 0x107   : > { %p901_p6 = por %p900_p7, %p899_p5 }
 0x108   : > { %p897_p4 = pneg %p896_p2 }
 0x109   : > { %p903_p8 = por %p902_p9, %p901_p6 }
 0x10b   : > { %p904_p10 = pnand %p903_p8, %p897_p4 }
 0x10d   : > { %907 = shalt.err (!%p904_p10)  }
 0x10e   : > { %s908_s27 = scalar_lea.vmem %s1556_s17, 16  ;;  %p1865_p0 = pmov %p1863_p1 }
 0x10f   : > { %p909_p12 = scmp.ne.s32.totalorder %s1556_s17, %s908_s27  ;;  %p915_p13 = scmp.lt.s32.totalorder %s1556_s17, %s1302_s15 }
 0x110   : > { %p916_p3 = scmp.lt.s32.totalorder %s1334_s3, %s908_s27 }
 0x111   : > { %p910_p11 = pnand %p909_p12, %p1865_p0 }
 0x112   : > { %p917_p2 = por %p916_p3, %p915_p13 }
 0x113   : > { %p911_p1 = pneg %p910_p11 }
 0x115   : > { %p918_p5 = pnand %p917_p2, %p911_p1 }
 0x117   : > { %921 = shalt.err (!%p918_p5)  }
 0x118   : > { %p1866_p7 = pmov %p1865_p0  ;;  %s240_s22 = sshll.u32 %s446_s6, 4  ;;  %s1592_s22 = int_to_ptr.vmem [resolvable:$true] %s240_s22 }
 0x119   : > { %s244_s30 = sadd.s32 2, %s1522_s4  ;;  %s451_s25 = scalar_lea.vmem %s1553_s8, 2 [#allocation2] }
 0x11a   : > { %580 = dma.hbm_to_vmem [thread:$0]  (%p1866_p7), %s212_s11, 16, %s1556_s17, %s1572_s24 }
 0x11b   : > { %p1867_p4 = pmov %p1865_p0  ;;  %p1868_p6 = pmov %p1865_p0 }
 0x11c   : > { %s528_s18 = sshll.u32 %s1568_s14, 4  ;;  %s257_s13 = sshll.u32 %s451_s25, 4  ;;  %s1622_s13 = int_to_ptr.vmem [resolvable:$true] %s257_s13 }
 0x11d   : > { %s584_s5 = scalar_select %p1867_p4, [#allocation5], [#allocation52] }
 0x11e   : > { %s1932_s30 = smov (!%p1868_p6, %s244_s30), 0  ;;  %s230_s9 = scalar_lea.hbm %s1847_s1, %s528_s18 }
 0x11f   : > { %s1603_s27 = sld [smem:[%s584_s5 + %s1932_s30]]  ;;  %s922_s29 = scalar_lea.hbm %s230_s9, 16 }
 0x120   : > { %p923_p9 = scmp.ne.s32.totalorder %s230_s9, %s922_s29  ;;  %p1869_p8 = pmov %p1865_p0 }
 0x121   : > { %p927_p0 = scmp.lt.u32.totalorder %s230_s9, %s1847_s1  ;;  %p928_p11 = scmp.lt.u32.totalorder %s1323_s26, %s922_s29 }
 0x122   : > { %p924_p10 = pnand %p923_p9, %p1869_p8  ;;  %p930_p13 = scmp.lt.u32.totalorder %s922_s29, %s230_s9 }
 0x123   : > { %p929_p1 = por %p928_p11, %p927_p0 }
 0x124   : > { %p925_p12 = pneg %p924_p10 }
 0x125   : > { %p931_p3 = por %p930_p13, %p929_p1 }
 0x127   : > { %p932_p2 = pnand %p931_p3, %p925_p12 }
 0x129   : > { %935 = shalt.err (!%p932_p2)  }
 0x12a   : > { %s936_s11 = scalar_lea.vmem %s1592_s22, 16  ;;  %p1870_p7 = pmov %p1867_p4 }
 0x12b   : > { %p937_p5 = scmp.ne.s32.totalorder %s1592_s22, %s936_s11  ;;  %p943_p9 = scmp.lt.s32.totalorder %s1592_s22, %s1302_s15 }
 0x12c   : > { %p944_p8 = scmp.lt.s32.totalorder %s1334_s3, %s936_s11 }
 0x12d   : > { %p938_p4 = pnand %p937_p5, %p1870_p7 }
 0x12e   : > { %p945_p10 = por %p944_p8, %p943_p9 }
 0x12f   : > { %p939_p6 = pneg %p938_p4 }
 0x131   : > { %p946_p0 = pnand %p945_p10, %p939_p6 }
 0x133   : > { %949 = shalt.err (!%p946_p0)  }
 0x134   : > { %p1871_p11 = pmov %p1870_p7  ;;  %s261_s29 = sadd.s32 3, %s1522_s4 }
 0x135   : > { %p1872_p12 = pmov %p1870_p7  ;;  %p1873_p1 = pmov %p1870_p7 }
 0x136   : > { %583 = dma.hbm_to_vmem [thread:$0]  (%p1871_p11), %s230_s9, 16, %s1592_s22, %s1572_s24 }
 0x137   : > { %s587_s14 = scalar_select %p1872_p12, [#allocation5], [#allocation53] }
 0x138   : > { %s1934_s29 = smov (!%p1873_p1, %s261_s29), 0  ;;  %s456_s30 = scalar_lea.vmem %s1553_s8, 3 [#allocation2] }
 0x139   : > { %s278_s25 = sadd.s32 4, %s1522_s4  ;;  %s530_s5 = sshll.u32 %s1603_s27, 4 }
 0x13a   : > { %s1632_s18 = sld [smem:[%s587_s14 + %s1934_s29]]  ;;  %s247_s17 = scalar_lea.hbm %s1847_s1, %s530_s5 }
 0x13b   : > { %s274_s6 = sshll.u32 %s456_s30, 4  ;;  %s950_s11 = scalar_lea.hbm %s247_s17, 16  ;;  %s1654_s6 = int_to_ptr.vmem [resolvable:$true] %s274_s6 }
 0x13c   : > { %p951_p13 = scmp.ne.s32.totalorder %s247_s17, %s950_s11  ;;  %p1874_p3 = pmov %p1873_p1 }
 0x13d   : > { %p955_p7 = scmp.lt.u32.totalorder %s247_s17, %s1847_s1  ;;  %p956_p4 = scmp.lt.u32.totalorder %s1323_s26, %s950_s11 }
 0x13e   : > { %p952_p2 = pnand %p951_p13, %p1874_p3  ;;  %p958_p9 = scmp.lt.u32.totalorder %s950_s11, %s247_s17 }
 0x13f   : > { %p957_p6 = por %p956_p4, %p955_p7 }
 0x140   : > { %p953_p5 = pneg %p952_p2 }
 0x141   : > { %p959_p8 = por %p958_p9, %p957_p6 }
 0x143   : > { %p960_p10 = pnand %p959_p8, %p953_p5 }
 0x145   : > { %963 = shalt.err (!%p960_p10)  }
 0x146   : > { %s964_s27 = scalar_lea.vmem %s1622_s13, 16  ;;  %p1875_p11 = pmov %p1873_p1 }
 0x147   : > { %p965_p0 = scmp.ne.s32.totalorder %s1622_s13, %s964_s27  ;;  %p971_p13 = scmp.lt.s32.totalorder %s1622_s13, %s1302_s15 }
 0x148   : > { %p972_p3 = scmp.lt.s32.totalorder %s1334_s3, %s964_s27 }
 0x149   : > { %p966_p12 = pnand %p965_p0, %p1875_p11 }
 0x14a   : > { %p973_p2 = por %p972_p3, %p971_p13 }
 0x14b   : > { %p967_p1 = pneg %p966_p12 }
 0x14d   : > { %p974_p4 = pnand %p973_p2, %p967_p1 }
 0x14f   : > { %977 = shalt.err (!%p974_p4)  }
 0x150   : > { %p1876_p7 = pmov %p1875_p11  ;;  %s461_s29 = scalar_lea.vmem %s1553_s8, 4 [#allocation2] }
 0x151   : > { %s532_s30 = sshll.u32 %s1632_s18, 4  ;;  %s291_s5 = sshll.u32 %s461_s29, 4  ;;  %s1684_s5 = int_to_ptr.vmem [resolvable:$true] %s291_s5 }
 0x152   : > { %586 = dma.hbm_to_vmem [thread:$0]  (%p1876_p7), %s247_s17, 16, %s1622_s13, %s1572_s24 }
 0x153   : > { %p1877_p5 = pmov %p1876_p7  ;;  %s264_s11 = scalar_lea.hbm %s1847_s1, %s532_s30 }
 0x154   : > { %s978_s9 = scalar_lea.hbm %s264_s11, 16  ;;  %p983_p11 = scmp.lt.u32.totalorder %s264_s11, %s1847_s1 }
 0x155   : > { %s590_s14 = scalar_select %p1877_p5, [#allocation5], [#allocation54] }
 0x156   : > { %p1878_p6 = pmov %p1877_p5  ;;  %p979_p9 = scmp.ne.s32.totalorder %s264_s11, %s978_s9 }
 0x157   : > { %p1879_p8 = pmov %p1877_p5  ;;  %p984_p12 = scmp.lt.u32.totalorder %s1323_s26, %s978_s9 }
 0x158   : > { %s1936_s25 = smov (!%p1878_p6, %s278_s25), 0  ;;  %p986_p13 = scmp.lt.u32.totalorder %s978_s9, %s264_s11 }
 0x159   : > { %s1665_s22 = sld [smem:[%s590_s14 + %s1936_s25]]  ;;  %p980_p10 = pnand %p979_p9, %p1879_p8 }
 0x15a   : > { %p985_p1 = por %p984_p12, %p983_p11 }
 0x15b   : > { %p981_p0 = pneg %p980_p10 }
 0x15c   : > { %p987_p3 = por %p986_p13, %p985_p1 }
 0x15e   : > { %p988_p2 = pnand %p987_p3, %p981_p0 }
 0x160   : > { %991 = shalt.err (!%p988_p2)  }
 0x161   : > { %s992_s25 = scalar_lea.vmem %s1654_s6, 16  ;;  %p1880_p7 = pmov %p1877_p5 }
 0x162   : > { %p993_p4 = scmp.ne.s32.totalorder %s1654_s6, %s992_s25  ;;  %p999_p9 = scmp.lt.s32.totalorder %s1654_s6, %s1302_s15 }
 0x163   : > { %p1000_p8 = scmp.lt.s32.totalorder %s1334_s3, %s992_s25 }
 0x164   : > { %p994_p5 = pnand %p993_p4, %p1880_p7 }
 0x165   : > { %p1001_p10 = por %p1000_p8, %p999_p9 }
 0x166   : > { %p995_p6 = pneg %p994_p5 }
 0x168   : > { %p1002_p11 = pnand %p1001_p10, %p995_p6 }
 0x16a   : > { %1005 = shalt.err (!%p1002_p11)  }
 0x16b   : > { %p1881_p12 = pmov %p1880_p7  ;;  %s295_s18 = sadd.s32 5, %s1522_s4 }
 0x16c   : > { %p1882_p0 = pmov %p1880_p7  ;;  %s466_s29 = scalar_lea.vmem %s1553_s8, 5 [#allocation2] }
 0x16d   : > { %589 = dma.hbm_to_vmem [thread:$0]  (%p1881_p12), %s264_s11, 16, %s1654_s6, %s1572_s24 }
 0x16e   : > { %s593_s27 = scalar_select %p1882_p0, [#allocation5], [#allocation55] }
 0x16f   : > { %p1883_p1 = pmov %p1882_p0  ;;  %s312_s14 = sadd.s32 6, %s1522_s4 }
 0x170   : > { %s534_s30 = sshll.u32 %s1665_s22, 4  ;;  %s308_s17 = sshll.u32 %s466_s29, 4  ;;  %s1716_s17 = int_to_ptr.vmem [resolvable:$true] %s308_s17 }
 0x171   : > { %s1938_s18 = smov (!%p1883_p1, %s295_s18), 0  ;;  %s281_s13 = scalar_lea.hbm %s1847_s1, %s534_s30 }
 0x172   : > { %s1694_s16 = sld [smem:[%s593_s27 + %s1938_s18]]  ;;  %s1006_s25 = scalar_lea.hbm %s281_s13, 16 }
 0x173   : > { %p1007_p13 = scmp.ne.s32.totalorder %s281_s13, %s1006_s25  ;;  %p1884_p3 = pmov %p1882_p0 }
 0x174   : > { %p1011_p7 = scmp.lt.u32.totalorder %s281_s13, %s1847_s1  ;;  %p1012_p5 = scmp.lt.u32.totalorder %s1323_s26, %s1006_s25 }
 0x175   : > { %p1008_p2 = pnand %p1007_p13, %p1884_p3  ;;  %p1014_p9 = scmp.lt.u32.totalorder %s1006_s25, %s281_s13 }
 0x176   : > { %p1013_p6 = por %p1012_p5, %p1011_p7 }
 0x177   : > { %p1009_p4 = pneg %p1008_p2 }
 0x178   : > { %p1015_p8 = por %p1014_p9, %p1013_p6 }
 0x17a   : > { %p1016_p10 = pnand %p1015_p8, %p1009_p4 }
 0x17c   : > { %1019 = shalt.err (!%p1016_p10)  }
 0x17d   : > { %s1020_s22 = scalar_lea.vmem %s1684_s5, 16  ;;  %p1885_p12 = pmov %p1882_p0 }
 0x17e   : > { %p1021_p11 = scmp.ne.s32.totalorder %s1684_s5, %s1020_s22  ;;  %p1027_p13 = scmp.lt.s32.totalorder %s1684_s5, %s1302_s15 }
 0x17f   : > { %p1028_p3 = scmp.lt.s32.totalorder %s1334_s3, %s1020_s22 }
 0x180   : > { %p1022_p0 = pnand %p1021_p11, %p1885_p12 }
 0x181   : > { %p1029_p2 = por %p1028_p3, %p1027_p13 }
 0x182   : > { %p1023_p1 = pneg %p1022_p0 }
 0x184   : > { %p1030_p5 = pnand %p1029_p2, %p1023_p1 }
 0x186   : > { %1033 = shalt.err (!%p1030_p5)  }
 0x187   : > { %p1886_p7 = pmov %p1885_p12  ;;  %s471_s18 = scalar_lea.vmem %s1553_s8, 6 [#allocation2] }
 0x188   : > { %s536_s29 = sshll.u32 %s1694_s16, 4  ;;  %s325_s30 = sshll.u32 %s471_s18, 4  ;;  %s1746_s30 = int_to_ptr.vmem [resolvable:$true] %s325_s30 }
 0x189   : > { %592 = dma.hbm_to_vmem [thread:$0]  (%p1886_p7), %s281_s13, 16, %s1684_s5, %s1572_s24 }
 0x18a   : > { %p1887_p4 = pmov %p1886_p7  ;;  %s298_s25 = scalar_lea.hbm %s1847_s1, %s536_s29 }
 0x18b   : > { %s1034_s11 = scalar_lea.hbm %s298_s25, 16  ;;  %p1039_p12 = scmp.lt.u32.totalorder %s298_s25, %s1847_s1 }
 0x18c   : > { %s596_s27 = scalar_select %p1887_p4, [#allocation5], [#allocation56] }
 0x18d   : > { %p1888_p6 = pmov %p1887_p4  ;;  %p1035_p9 = scmp.ne.s32.totalorder %s298_s25, %s1034_s11 }
 0x18e   : > { %p1889_p8 = pmov %p1887_p4  ;;  %p1040_p0 = scmp.lt.u32.totalorder %s1323_s26, %s1034_s11 }
 0x18f   : > { %s1940_s14 = smov (!%p1888_p6, %s312_s14), 0  ;;  %p1042_p13 = scmp.lt.u32.totalorder %s1034_s11, %s298_s25 }
 0x190   : > { %s1727_s6 = sld [smem:[%s596_s27 + %s1940_s14]]  ;;  %p1036_p10 = pnand %p1035_p9, %p1889_p8 }
 0x191   : > { %p1041_p1 = por %p1040_p0, %p1039_p12 }
 0x192   : > { %p1037_p11 = pneg %p1036_p10 }
 0x193   : > { %p1043_p3 = por %p1042_p13, %p1041_p1 }
 0x195   : > { %p1044_p2 = pnand %p1043_p3, %p1037_p11 }
 0x197   : > { %1047 = shalt.err (!%p1044_p2)  }
 0x198   : > { %s1048_s14 = scalar_lea.vmem %s1716_s17, 16  ;;  %p1890_p7 = pmov %p1887_p4 }
 0x199   : > { %p1049_p5 = scmp.ne.s32.totalorder %s1716_s17, %s1048_s14  ;;  %p1055_p9 = scmp.lt.s32.totalorder %s1716_s17, %s1302_s15 }
 0x19a   : > { %p1056_p8 = scmp.lt.s32.totalorder %s1334_s3, %s1048_s14 }
 0x19b   : > { %p1050_p4 = pnand %p1049_p5, %p1890_p7 }
 0x19c   : > { %p1057_p10 = por %p1056_p8, %p1055_p9 }
 0x19d   : > { %p1051_p6 = pneg %p1050_p4 }
 0x19f   : > { %p1058_p0 = pnand %p1057_p10, %p1051_p6 }
 0x1a1   : > { %1061 = shalt.err (!%p1058_p0)  }
 0x1a2   : > { %p1891_p12 = pmov %p1890_p7  ;;  %s329_s16 = sadd.s32 7, %s1522_s4 }
 0x1a3   : > { %p1892_p11 = pmov %p1890_p7  ;;  %p1893_p1 = pmov %p1890_p7 }
 0x1a4   : > { %595 = dma.hbm_to_vmem [thread:$0]  (%p1891_p12), %s298_s25, 16, %s1716_s17, %s1572_s24 }
 0x1a5   : > { %s599_s22 = scalar_select %p1892_p11, [#allocation5], [#allocation57] }
 0x1a6   : > { %s1942_s16 = smov (!%p1893_p1, %s329_s16), 0  ;;  %s476_s18 = scalar_lea.vmem %s1553_s8, 7 [#allocation2] }
 0x1a7   : > { %s538_s27 = sshll.u32 %s1727_s6, 4  ;;  %s330_s29 = sld [smem:[%s599_s22 + %s1942_s16]] }
 0x1a8   : > { %s315_s11 = scalar_lea.hbm %s1847_s1, %s538_s27  ;;  %s342_s5 = sshll.u32 %s476_s18, 4  ;;  %s343_s5 = int_to_ptr.vmem [resolvable:$true] %s342_s5 }
 0x1a9   : > { %s1062_s13 = scalar_lea.hbm %s315_s11, 16  ;;  %p1894_p3 = pmov %p1893_p1 }
 0x1aa   : > { %p1063_p13 = scmp.ne.s32.totalorder %s315_s11, %s1062_s13  ;;  %p1067_p7 = scmp.lt.u32.totalorder %s315_s11, %s1847_s1 }
 0x1ab   : > { %p1068_p4 = scmp.lt.u32.totalorder %s1323_s26, %s1062_s13  ;;  %p1070_p9 = scmp.lt.u32.totalorder %s1062_s13, %s315_s11 }
 0x1ac   : > { %p1064_p2 = pnand %p1063_p13, %p1894_p3 }
 0x1ad   : > { %p1069_p6 = por %p1068_p4, %p1067_p7 }
 0x1ae   : > { %p1065_p5 = pneg %p1064_p2 }
 0x1af   : > { %p1071_p8 = por %p1070_p9, %p1069_p6 }
 0x1b1   : > { %p1072_p10 = pnand %p1071_p8, %p1065_p5 }
 0x1b3   : > { %1075 = shalt.err (!%p1072_p10)  }
 0x1b4   : > { %s1076_s4 = scalar_lea.vmem %s1746_s30, 16  ;;  %p1895_p12 = pmov %p1893_p1 }
 0x1b5   : > { %p1077_p0 = scmp.ne.s32.totalorder %s1746_s30, %s1076_s4  ;;  %p1083_p13 = scmp.lt.s32.totalorder %s1746_s30, %s1302_s15 }
 0x1b6   : > { %p1084_p3 = scmp.lt.s32.totalorder %s1334_s3, %s1076_s4 }
 0x1b7   : > { %p1078_p11 = pnand %p1077_p0, %p1895_p12 }
 0x1b8   : > { %p1085_p2 = por %p1084_p3, %p1083_p13 }
 0x1b9   : > { %p1079_p1 = pneg %p1078_p11 }
 0x1bb   : > { %p1086_p4 = pnand %p1085_p2, %p1079_p1 }
 0x1bd   : > { %1089 = shalt.err (!%p1086_p4)  }
 0x1be   : > { %p1896_p7 = pmov %p1895_p12  ;;  %s540_s8 = sshll.u32 %s330_s29, 4 }
 0x1bf   : > { %s332_s16 = scalar_lea.hbm %s1847_s1, %s540_s8 }
 0x1c0   : > { %598 = dma.hbm_to_vmem [thread:$0]  (%p1896_p7), %s315_s11, 16, %s1746_s30, %s1572_s24 }
 0x1c1   : > { %s1090_s22 = scalar_lea.hbm %s332_s16, 16  ;;  %p1897_p6 = pmov %p1896_p7 }
 0x1c2   : > { %p1091_p5 = scmp.ne.s32.totalorder %s332_s16, %s1090_s22  ;;  %p1095_p10 = scmp.lt.u32.totalorder %s332_s16, %s1847_s1 }
 0x1c3   : > { %p1096_p0 = scmp.lt.u32.totalorder %s1323_s26, %s1090_s22  ;;  %p1098_p11 = scmp.lt.u32.totalorder %s1090_s22, %s332_s16 }
 0x1c4   : > { %p1092_p9 = pnand %p1091_p5, %p1897_p6 }
 0x1c5   : > { %p1097_p12 = por %p1096_p0, %p1095_p10 }
 0x1c6   : > { %p1093_p8 = pneg %p1092_p9 }
 0x1c7   : > { %p1099_p1 = por %p1098_p11, %p1097_p12 }
 0x1c9   : > { %p1100_p13 = pnand %p1099_p1, %p1093_p8 }
 0x1cb   : > { %1103 = shalt.err (!%p1100_p13)  }
 0x1cc   : > { %s1104_s30 = scalar_lea.vmem %s343_s5, 16  ;;  %p1898_p2 = pmov %p1897_p6 }
 0x1cd   : > { %p1105_p3 = scmp.ne.s32.totalorder %s343_s5, %s1104_s30  ;;  %p1111_p5 = scmp.lt.s32.totalorder %s343_s5, %s1302_s15 }
 0x1ce   : > { %p1112_p6 = scmp.lt.s32.totalorder %s1334_s3, %s1104_s30 }
 0x1cf   : > { %p1106_p4 = pnand %p1105_p3, %p1898_p2 }
 0x1d0   : > { %p1113_p9 = por %p1112_p6, %p1111_p5 }
 0x1d1   : > { %p1107_p7 = pneg %p1106_p4 }
 0x1d3   : > { %p1114_p0 = pnand %p1113_p9, %p1107_p7 }
 0x1d5   : > { %1117 = shalt.err (!%p1114_p0)  }
 0x1d6   : > { %p1899_p10 = pmov %p1898_p2  ;;  %s65_s26 = scalar_lea.vmem [#allocation6], %s1290_s10 }
 0x1d7   : > { %s1900_s29 = sand.u32 1, %s1184_s21 }
 0x1d8   : > { %601 = dma.hbm_to_vmem [thread:$0]  (%p1899_p10), %s332_s16, 16, %s343_s5, %s1572_s24 }
 0x1d9   : > { %s346_s12 = scalar_lea.sflag [#allocation3], %s1900_s29 }
 0x1da   : > { %1168 = dma.done.wait %s346_s12, 128 }
 0x1db   : > { %1169 = vsyncadd %s346_s12, 4294967168  ;;  %s1901_s9 = smov %s1900_s29  ;;  %s545_s3 = sshll.u32 %s1267_s28, 7 }
 0x1dc   : > { %s542_s15 = sshll.u32 %s1901_s9, 3  ;;  %s384_s11 = sshll.u32 %s65_s26, 4  ;;  %s1802_s11 = int_to_ptr.vmem [resolvable:$true] %s384_s11 }
 0x1dd   : > { %s364_s13 = scalar_lea.vmem [#allocation2], %s542_s15  ;;  %s1800_s24 = scalar_lea.hbm %s1848_s2, %s545_s3 }
 0x1de   : > { %v365_v0 = vld [vmem:[%s364_s13] sm:$0xff]  ;;  %s1902_s21 = sand.u32 1, %s1180_s20   ;;  %s1118_s5 = scalar_lea.vmem %s1802_s11, 128 }
 0x1df   : > { %v366_v1 = vmul.f32 11.313708, %v365_v0  ;;  %s369_s10 = scalar_lea.sflag [#allocation7], %s1902_s21  ;;  %p1119_p8 = scmp.ne.s32.totalorder %s1802_s11, %s1118_s5 }
 0x1e0   : > { %p1903_p12 = scmp.ne.s32.totalorder %s1860_s7, 0  ;;  %s1203_s28 = smov [#allocation6]  }
 0x1e1   : > { %367 = vst [vmem:[%s65_s26] sm:$0xff] %v366_v1  ;;  %s1122_s25 = sshll.u32 %s1203_s28, 4  ;;  %s1123_s25 = int_to_ptr.vmem [resolvable:$false] %s1122_s25 }
 0x1e2   : > { %p1120_p11 = pnand %p1119_p8, %p1903_p12  ;;  %s1124_s4 = scalar_lea.vmem %s1123_s25, 256 }
 0x1e3   : > { %p1125_p13 = scmp.lt.s32.totalorder %s1802_s11, %s1123_s25  ;;  %p1126_p3 = scmp.lt.s32.totalorder %s1124_s4, %s1118_s5 }
 0x1e4   : > { %p1121_p1 = pneg %p1120_p11 }
 0x1e5   : > { %p1127_p2 = por %p1126_p3, %p1125_p13 }
 0x1e7   : > { %p1128_p4 = pnand %p1127_p2, %p1121_p1 }
 0x1e9   : > { %1131 = shalt.err (!%p1128_p4)
}
 0x1ea   : > { %s1132_s8 = scalar_lea.hbm %s1800_s24, 128  ;;  %s1136_s16 = scalar_lea.hbm %s1848_s2, 512 }
 0x1eb   : > { %p1133_p7 = scmp.ne.s32.totalorder %s1800_s24, %s1132_s8  ;;  %p1137_p9 = scmp.lt.u32.totalorder %s1800_s24, %s1848_s2 }
 0x1ec   : > { %p1138_p0 = scmp.lt.u32.totalorder %s1136_s16, %s1132_s8  ;;  %p1140_p8 = scmp.lt.u32.totalorder %s1132_s8, %s1800_s24 }
 0x1ed   : > { %p1134_p5 = pnand %p1133_p7, %p1903_p12 }
 0x1ee   : > { %p1139_p10 = por %p1138_p0, %p1137_p9 }
 0x1ef   : > { %p1135_p6 = pneg %p1134_p5 }
 0x1f0   : > { %p1141_p11 = por %p1140_p8, %p1139_p10 }
 0x1f2   : > { %p1142_p1 = pnand %p1141_p11, %p1135_p6 }
 0x1f4   : > { %1145 = shalt.err (!%p1142_p1)
}
 0x1f5   : > { %602 = dma.vmem_to_hbm [thread:$0]  (%p1903_p12), %s1802_s11, 128, %s1800_s24, %s369_s10  }
 0x1f6 PF: > { %s1904_s27 = sld [smem:[#allocation63_spill]]  ;;  %p610_p13 = scmp.ge.s32.totalorder %s1192_s23, 1 }
 0x1f7   : > { %s396_s30 = sand.u32 1, %s1176_s19  }
 0x1f8   : > { %s397_s26 = scalar_lea.sflag [#allocation7], %s396_s30 }
 0x1fc   : > { %p1905_p3 = scmp.ne.s32.totalorder %s1904_s27, 0 }
 0x1fe   : > { %p605_p2 = pnand %p610_p13, %p1905_p3 }
 0x200   : > { %1171 = dma.done.wait (!%p605_p2), %s397_s26, 128  }
 0x201   : > { %1173 = vsyncadd (!%p605_p2), %s397_s26, 4294967168  ;;  %s19_s23 = sadd.s32 1, %s1192_s23   ;;  %s1906_s29 = sld [smem:[#allocation64_spill]] }
 0x202   : > { %p16_p4 = scmp.ge.s32.totalorder %s19_s23, 5   ;;  %s1907_s21 = sld [smem:[#allocation61_spill]] }
 0x203   : > { %s1908_s22 = sld [smem:[#allocation62_spill]]  ;;  %s1909_s19 = smov %s1180_s20 }
 0x204   :  { %18 = sbr.rel (!%p16_p4) target bundleno = 16 (0x10), region = 151 }
 0x207   : > { %s1910_s20 = smov %s1906_s29 }
 0x20b   :  { %402 = vsyncpa [#allocation7], 1 }
 0x20c   :  { %404 = vsyncpa [#allocation7 + $0x1], 1 }
 0x20d   :  { %405 = vsyncmov [#allocation3] }
 0x210   :  { %s406_s7 = vpop.sfrf %405 }
 0x211   :  { %p548_p12 = scmp.ne.s32.totalorder %s406_s7, 0 }
 0x213   :  { %410 = shalt.err (%p548_p12)  }
 0x214   :  { %412 = vsyncmov [#allocation3 + $0x1] }
 0x217   :  { %s413_s12 = vpop.sfrf %412 }
 0x218   :  { %p549_p7 = scmp.ne.s32.totalorder %s413_s12, 0 }
 0x21a   :  { %417 = shalt.err (%p549_p7)  }

</bundles_post_ra>
